<compile_context>
chip_gen: v7x
topology: tpu7x:2x2x1
jax: 0.10.0
libtpu: 0.0.40
codegen_flags: <defaults>
</compile_context>

<pallas_src>
import jax
import jax.numpy as jnp
from jax.experimental import pallas as pl
from jax.experimental.pallas import tpu as pltpu


def _split_scale_kernel(x_ref, box_ref, score_ref):
    # x_ref:     (1, TN, C)  raw head output tile, C = 5 + nc on lanes
    # box_ref:   (1, TN, 4)
    # score_ref: (1, TN, nc)
    x = x_ref[0]                              # single VMEM load of the tile
    box_ref[0] = x[:, 0:4]                    # box = x[..., :4]
    score_ref[0] = x[:, 5:] * x[:, 4:5]       # score = cls * conf (lane bcast)


def split_boxes_scores(x, *, tile_n=2048):
    """Fused: box = x[..., :4]; score = x[..., 5:] * x[..., 4:5].

    One pass over x in its native (B, N, C) layout; box and score are both
    kernel outputs, so x is read exactly once and nothing is re-materialized
    through HBM by the wrapper.
    """
    B, N, C = x.shape
    nc = C - 5
    assert nc >= 1
    assert tile_n % 8 == 0
    # Full extent for small N; otherwise a fixed multiple-of-8 tile.  The
    # ragged last block (N % tn != 0) is masked by Pallas automatically.
    tn = N if N <= tile_n else tile_n
    grid = (B, pl.cdiv(N, tn))

    box, score = pl.pallas_call(
        _split_scale_kernel,
        out_shape=(
            jax.ShapeDtypeStruct((B, N, 4), x.dtype),
            jax.ShapeDtypeStruct((B, N, nc), x.dtype),
        ),
        grid_spec=pltpu.PrefetchScalarGridSpec(
            num_scalar_prefetch=0,
            grid=grid,
            in_specs=[
                pl.BlockSpec((1, tn, C), lambda b, n: (b, n, 0)),
            ],
            out_specs=(
                pl.BlockSpec((1, tn, 4), lambda b, n: (b, n, 0)),
                pl.BlockSpec((1, tn, nc), lambda b, n: (b, n, 0)),
            ),
        ),
        compiler_params=pltpu.CompilerParams(
            # Both axes independent -> shard across v7x's two TensorCores.
            dimension_semantics=("parallel", "parallel"),
        ),
    )(x)
    return box, score


class ONNX_TRT:
    """JAX/Pallas port of yolov6 ONNX_TRT wrapper (max_wh must be None)."""

    def __init__(self, max_obj=100, iou_thres=0.45, score_thres=0.25, max_wh=None):
        assert max_wh is None
        self.background_class = -1
        self.box_coding = 1
        self.iou_threshold = iou_thres
        self.max_obj = max_obj
        self.plugin_version = "1"
        self.score_activation = 0
        self.score_threshold = score_thres

    def _trt_nms_stub(self, boxes, scores, key):
        # Mirrors TRT_NMS.forward: the plugin stub only consumes scores.shape
        # and returns random placeholders with the plugin's output
        # shapes/dtypes (deterministic here via the PRNG key).
        batch_size, _, num_classes = scores.shape
        k1, k2, k3, k4 = jax.random.split(key, 4)
        num_det = jax.random.randint(
            k1, (batch_size, 1), 0, self.max_obj, dtype=jnp.int32)
        det_boxes = jax.random.normal(
            k2, (batch_size, self.max_obj, 4), dtype=jnp.float32)
        det_scores = jax.random.normal(
            k3, (batch_size, self.max_obj), dtype=jnp.float32)
        det_classes = jax.random.randint(
            k4, (batch_size, self.max_obj), 0, num_classes, dtype=jnp.int32)
        return num_det, det_boxes, det_scores, det_classes

    def __call__(self, x, key):
        box, score = split_boxes_scores(x)
        # NOTE: like the PyTorch stub, the random outputs depend on box/score
        # only via their shapes; the __main__ block consumes box/score
        # directly so the Pallas kernel is actually executed and validated.
        return self._trt_nms_stub(box, score, key)


class End2End:
    """JAX port of End2End: detector backbone followed by the ONNX_TRT head."""

    def __init__(self, model, max_obj=100, iou_thres=0.45, score_thres=0.25,
                 max_wh=None):
        # TODO(synk): the YOLO detector backbone is not part of this spec; any
        #             callable mapping the input to a (B, N, 5+nc) head output
        #             can be plugged in (identity is used in the demo).
        # TODO(synk): only the TRT (EfficientNMS) path is ported; the ONNX_ORT
        #             path (max_wh not None) is not implemented.
        assert max_wh is None
        self.model = model
        self.end2end = ONNX_TRT(max_obj, iou_thres, score_thres, max_wh)

    def __call__(self, x, key):
        x = self.model(x)
        return self.end2end(x, key)


if __name__ == "__main__":
    # Small shapes consistent with the forward: (batch, num_boxes, 5 + nc).
    B, N, NC = 2, 1024, 8
    C = 5 + NC

    key = jax.random.PRNGKey(0)
    kx, knms = jax.random.split(key)
    x = jax.random.normal(kx, (B, N, C), dtype=jnp.float32)

    model = End2End(model=lambda t: t, max_obj=16, iou_thres=0.45,
                    score_thres=0.25, max_wh=None)
    num_det, det_boxes, det_scores, det_classes = model(x, knms)
    jax.block_until_ready((num_det, det_boxes, det_scores, det_classes))

    # --- Validate the fused Pallas hot path against plain JAX ---------------
    # 1) Small / full-extent tile path.
    box_pl, score_pl = jax.jit(split_boxes_scores)(x)
    jax.block_until_ready((box_pl, score_pl))
    assert jnp.allclose(box_pl, x[:, :, :4], atol=1e-6)
    assert jnp.allclose(score_pl, x[:, :, 5:] * x[:, :, 4:5], atol=1e-6)

    # 2) Tiled path with a ragged last block (N not a multiple of the tile),
    #    exercising the masked-write behavior used for real YOLO sizes.
    N2 = 1000
    x2 = jax.random.normal(jax.random.PRNGKey(1), (B, N2, C), dtype=jnp.float32)
    box2, score2 = jax.jit(lambda t: split_boxes_scores(t, tile_n=256))(x2)
    jax.block_until_ready((box2, score2))
    assert jnp.allclose(box2, x2[:, :, :4], atol=1e-6)
    assert jnp.allclose(score2, x2[:, :, 5:] * x2[:, :, 4:5], atol=1e-6)

    # Shape/dtype checks on the NMS-plugin stub outputs.
    assert num_det.shape == (B, 1) and num_det.dtype == jnp.int32
    assert det_boxes.shape == (B, 16, 4) and det_boxes.dtype == jnp.float32
    assert det_scores.shape == (B, 16) and det_scores.dtype == jnp.float32
    assert det_classes.shape == (B, 16) and det_classes.dtype == jnp.int32

    print("KERNEL_OK")
</pallas_src>

<mosaic_0001>
module attributes {stable_mosaic.version = 11 : i64} {
  func.func @_split_scale_kernel(%arg0: i32, %arg1: i32, %arg2: memref<1x1024x13xf32, #tpu.memory_space<vmem>>, %arg3: memref<1x1024x4xf32, #tpu.memory_space<vmem>>, %arg4: memref<1x1024x8xf32, #tpu.memory_space<vmem>>) attributes {dimension_semantics = [#tpu.dimension_semantics<parallel>, #tpu.dimension_semantics<parallel>], iteration_bounds = array<i64: 2, 1>, scalar_prefetch = 0 : i64, scratch_operands = 0 : i64, tpu.core_type = #tpu.core_type<tc>, window_params = [{transform_indices = @transform_0, window_bounds = array<i64: 1, 1024, 13>}, {transform_indices = @transform_1, window_bounds = array<i64: 1, 1024, 4>}, {transform_indices = @transform_2, window_bounds = array<i64: 1, 1024, 8>}]} {
    %c0 = arith.constant 0 : index
    %c0_0 = arith.constant 0 : index
    %c0_1 = arith.constant 0 : index
    %0 = vector.load %arg2[%c0, %c0_0, %c0_1] : memref<1x1024x13xf32, #tpu.memory_space<vmem>>, vector<1x1024x13xf32>
    %1 = vector.shape_cast %0 : vector<1x1024x13xf32> to vector<1024x13xf32>
    %2 = vector.extract_strided_slice %1 {offsets = [0, 0], sizes = [1024, 4], strides = [1, 1]} : vector<1024x13xf32> to vector<1024x4xf32>
    %c0_2 = arith.constant 0 : index
    %c0_3 = arith.constant 0 : index
    %c0_4 = arith.constant 0 : index
    %3 = vector.load %arg3[%c0_2, %c0_3, %c0_4] : memref<1x1024x4xf32, #tpu.memory_space<vmem>>, vector<1x1024x4xf32>
    %4 = vector.shape_cast %3 : vector<1x1024x4xf32> to vector<1024x4xf32>
    %5 = vector.shape_cast %2 : vector<1024x4xf32> to vector<1x1024x4xf32>
    tpu.vector_store %arg3[%c0_2, %c0_3, %c0_4], %5 {strides = array<i32>} : memref<1x1024x4xf32, #tpu.memory_space<vmem>>, vector<1x1024x4xf32>,
    %6 = vector.extract_strided_slice %1 {offsets = [0, 5], sizes = [1024, 8], strides = [1, 1]} : vector<1024x13xf32> to vector<1024x8xf32>
    %7 = vector.extract_strided_slice %1 {offsets = [0, 4], sizes = [1024, 1], strides = [1, 1]} : vector<1024x13xf32> to vector<1024x1xf32>
    %8 = vector.broadcast %7 : vector<1024x1xf32> to vector<1024x8xf32>
    %9 = arith.mulf %6, %8 : vector<1024x8xf32>
    %c0_5 = arith.constant 0 : index
    %c0_6 = arith.constant 0 : index
    %c0_7 = arith.constant 0 : index
    %10 = vector.load %arg4[%c0_5, %c0_6, %c0_7] : memref<1x1024x8xf32, #tpu.memory_space<vmem>>, vector<1x1024x8xf32>
    %11 = vector.shape_cast %10 : vector<1x1024x8xf32> to vector<1024x8xf32>
    %12 = vector.shape_cast %9 : vector<1024x8xf32> to vector<1x1024x8xf32>
    tpu.vector_store %arg4[%c0_5, %c0_6, %c0_7], %12 {strides = array<i32>} : memref<1x1024x8xf32, #tpu.memory_space<vmem>>, vector<1x1024x8xf32>,
    return
  }
  func.func @transform_0(%arg0: i32, %arg1: i32) -> (i32, i32, i32) {
    %c0_i32 = arith.constant 0 : i32
    %c0_i32_0 = arith.constant 0 : i32
    return %arg0, %arg1, %c0_i32 : i32, i32, i32
  }
  func.func @transform_1(%arg0: i32, %arg1: i32) -> (i32, i32, i32) {
    %c0_i32 = arith.constant 0 : i32
    %c0_i32_0 = arith.constant 0 : i32
    return %arg0, %arg1, %c0_i32 : i32, i32, i32
  }
  func.func @transform_2(%arg0: i32, %arg1: i32) -> (i32, i32, i32) {
    %c0_i32 = arith.constant 0 : i32
    %c0_i32_0 = arith.constant 0 : i32
    return %arg0, %arg1, %c0_i32 : i32, i32, i32
  }
}

</mosaic_0001>

<bundles_post_ra>
// kernel: tpu_custom_call.1
= control target key start
LH: loop header
LB: loop body
LE: loop exit
PB: predicated region body
PF: predicated region fallthrough
CT: control target
= control target key end

     0   :  { %s2095_s9 = smov 0   ;;  %s2097_s10 = smov 0   ;;  %s3934_s0 = inlined_call_operand.vmem [shape: f32[2,1024,13], index: 0, kind: input, shape index: {}]   ;;  %s3935_s1 = inlined_call_operand.vmem [shape: f32[2,1024,4], index: 1, kind: output, shape index: {0}]   ;;  %s3936_s2 = inlined_call_operand.vmem [shape: f32[2,1024,8], index: 2, kind: output, shape index: {1}]  }
   0x1   :  { %s2099_s11 = smov 0  }
   0x2 LB: > { %s25_s12 = sadd.s32 1, %s2072_s10  ;;  %p2014_p0 = scmp.ge.s32.totalorder %s2076_s11, 1  ;;  %s2076_s11 = sphi %s2099_s11, %s13_s11   ;;  %s2072_s10 = sphi %s2097_s10, %s4382_s10   ;;  %s2068_s9 = sphi %s2095_s9, %s4381_s9  }
   0x3   : > { %p27_p1 = scmp.ge.s32.totalorder %s25_s12, 2  ;;  %p138_p2 = scmp.lt.s32.totalorder %s2076_s11, 3 }
   0x5   : > { %s4384_s12 = smov (%p27_p1, %s25_s12), 0  ;;  %p139_p3 = pnand %p2014_p0, %p138_p2 }
   0x7   : > { %142 = sbr.rel (%p139_p3) target bundleno = 657 (0x291), region = 24 }
   0xe   : > { %p178_p4 = scmp.lt.s32.totalorder %s2068_s9, 1  ;;  %v2078_v0 = vmov 4   ;;  %vm335_vm0 = vcmask 31744   ;;  %s2079_s20 = smov 123   ;;  %vm1744_vm1 = vcmask 64512  }
   0xf   : > { %2053 = vset.pattern.permute.xlu1 %v2078_v0  ;;  %2052 = vset.pattern.permute.xlu0 %v2078_v0 }
  0x10   : > { %s4386_s9 = smov (!%p178_p4, %s2068_s9), 1 }
  0x11   : > { %s2113_s13 = sshll.u32 %s4386_s9, 10 }
  0x12   : > { %s2119_s16 = scalar_lea.vmem %s3934_s0, %s2113_s13  ;;  %s2125_s19 = scalar_lea.vmem %s3935_s1, %s2113_s13 }
  0x13   : > { %v2128_v1 = vld [vmem:[%s2119_s16 + $0x10] sm:$0xff]  ;;  %v2131_v2 = vld [vmem:[%s2119_s16] sm:$0xff]  ;;  %v2134_v3 = vld [vmem:[%s2119_s16 + $0x18] sm:$0xff]  ;;  %s3475_s23 = scalar_lea.vmem %s3936_s2, %s2113_s13 }
  0x14   : > { %4071 = vst [vmem:[#allocation2_spill] sm:$0xff] %v2128_v1  ;;  %4072 = vst [vmem:[#allocation3_spill] sm:$0xff] %v2131_v2  ;;  %476 = vperm.xlu1 %2053, %v2128_v1   ;;  %466 = vperm.xlu0 %2052, %v2131_v2   ;;  %v2148_v4 = vld [vmem:[%s2119_s16 + $0x8] sm:$0xff]  ;;  %v2154_v6 = vld [vmem:[%s2119_s16 + $0x20] sm:$0xff] }
  0x15   : > { %4073 = vst [vmem:[#allocation4_spill] sm:$0xff] %v2134_v3  ;;  %338 = vst.msk [vmem:[%s2125_s19 + $0x10] sm:$0xff] %vm335_vm0, %v2128_v1  ;;  %v2151_v5 = vld [vmem:[%s2119_s16 + $0x28] sm:$0xff]  ;;  %v2166_v7 = vld [vmem:[%s2119_s16 + $0x38] sm:$0xff] }
  0x16   : > { %336 = vst.msk [vmem:[%s2125_s19] sm:$0xff] %vm335_vm0, %v2131_v2  ;;  %339 = vst.msk [vmem:[%s2125_s19 + $0x18] sm:$0xff] %vm335_vm0, %v2134_v3  ;;  %v2169_v8 = vld [vmem:[%s2119_s16 + $0x30] sm:$0xff]  ;;  %v2172_v9 = vld [vmem:[%s2119_s16 + $0x48] sm:$0xff] }
  0x17   : > { %4074 = vst [vmem:[#allocation5_spill] sm:$0xff] %v2148_v4  ;;  %4075 = vst [vmem:[#allocation6_spill] sm:$0xff] %v2151_v5  ;;  %v2184_v10 = vld [vmem:[%s2119_s16 + $0x40] sm:$0xff]  ;;  %v2187_v11 = vld [vmem:[%s2119_s16 + $0x58] sm:$0xff] }
  0x18   : > { %4076 = vst [vmem:[#allocation7_spill] sm:$0xff] %v2154_v6  ;;  %337 = vst.msk [vmem:[%s2125_s19 + $0x8] sm:$0xff] %vm335_vm0, %v2148_v4  ;;  %v2190_v12 = vld [vmem:[%s2119_s16 + $0x50] sm:$0xff]  ;;  %v2202_v13 = vld [vmem:[%s2119_s16 + $0x68] sm:$0xff]  ;;  %481 = vperm.xlu1 %2053, %v2134_v3   ;;  %471 = vperm.xlu0 %2052, %v2148_v4  }
  0x19   : > { %341 = vst.msk [vmem:[%s2125_s19 + $0x28] sm:$0xff] %vm335_vm0, %v2151_v5  ;;  %340 = vst.msk [vmem:[%s2125_s19 + $0x20] sm:$0xff] %vm335_vm0, %v2154_v6  ;;  %v2205_v14 = vld [vmem:[%s2119_s16 + $0x60] sm:$0xff]  ;;  %v2208_v15 = vld [vmem:[%s2119_s16 + $0x78] sm:$0xff] }
  0x1a   : > { %4077 = vst [vmem:[#allocation8_spill] sm:$0xff] %v2166_v7  ;;  %4078 = vst [vmem:[#allocation9_spill] sm:$0xff] %v2169_v8  ;;  %v2222_v16 = vld [vmem:[%s2119_s16 + $0x70] sm:$0xff]  ;;  %v2225_v17 = vld [vmem:[%s2119_s16 + $0x88] sm:$0xff] }
  0x1b   : > { %4079 = vst [vmem:[#allocation10_spill] sm:$0xff] %v2172_v9  ;;  %343 = vst.msk [vmem:[%s2125_s19 + $0x38] sm:$0xff] %vm335_vm0, %v2166_v7  ;;  %v2228_v18 = vld [vmem:[%s2119_s16 + $0x80] sm:$0xff]  ;;  %v2240_v19 = vld [vmem:[%s2119_s16 + $0x98] sm:$0xff] }
  0x1c   : > { %342 = vst.msk [vmem:[%s2125_s19 + $0x30] sm:$0xff] %vm335_vm0, %v2169_v8  ;;  %345 = vst.msk [vmem:[%s2125_s19 + $0x48] sm:$0xff] %vm335_vm0, %v2172_v9  ;;  %v2243_v20 = vld [vmem:[%s2119_s16 + $0x90] sm:$0xff]  ;;  %v2246_v21 = vld [vmem:[%s2119_s16 + $0xa8] sm:$0xff]  ;;  %491 = vperm.xlu1 %2053, %v2151_v5   ;;  %486 = vperm.xlu0 %2052, %v2154_v6  }
  0x1d   : > { %4080 = vst [vmem:[#allocation11_spill] sm:$0xff] %v2184_v10  ;;  %4081 = vst [vmem:[#allocation12_spill] sm:$0xff] %v2187_v11  ;;  %v2258_v22 = vld [vmem:[%s2119_s16 + $0xa0] sm:$0xff]  ;;  %v2261_v23 = vld [vmem:[%s2119_s16 + $0xb8] sm:$0xff] }
  0x1e   : > { %4082 = vst [vmem:[#allocation13_spill] sm:$0xff] %v2190_v12  ;;  %344 = vst.msk [vmem:[%s2125_s19 + $0x40] sm:$0xff] %vm335_vm0, %v2184_v10  ;;  %v2264_v24 = vld [vmem:[%s2119_s16 + $0xb0] sm:$0xff]  ;;  %v2276_v25 = vld [vmem:[%s2119_s16 + $0xc8] sm:$0xff] }
  0x1f   : > { %347 = vst.msk [vmem:[%s2125_s19 + $0x58] sm:$0xff] %vm335_vm0, %v2187_v11  ;;  %346 = vst.msk [vmem:[%s2125_s19 + $0x50] sm:$0xff] %vm335_vm0, %v2190_v12  ;;  %v2279_v26 = vld [vmem:[%s2119_s16 + $0xc0] sm:$0xff]  ;;  %v2282_v27 = vld [vmem:[%s2119_s16 + $0xd8] sm:$0xff] }
  0x20   : > { %4083 = vst [vmem:[#allocation14_spill] sm:$0xff] %v2202_v13  ;;  %4084 = vst [vmem:[#allocation15_spill] sm:$0xff] %v2205_v14  ;;  %v2296_v28 = vld [vmem:[%s2119_s16 + $0xd0] sm:$0xff]  ;;  %v2299_v29 = vld [vmem:[%s2119_s16 + $0xe8] sm:$0xff]  ;;  %501 = vperm.xlu1 %2053, %v2166_v7   ;;  %496 = vperm.xlu0 %2052, %v2169_v8  }
  0x21   : > { %4085 = vst [vmem:[#allocation16_spill] sm:$0xff] %v2208_v15  ;;  %349 = vst.msk [vmem:[%s2125_s19 + $0x68] sm:$0xff] %vm335_vm0, %v2202_v13  ;;  %v2302_v30 = vld [vmem:[%s2119_s16 + $0xe0] sm:$0xff]  ;;  %v2314_v31 = vld [vmem:[%s2119_s16 + $0xf8] sm:$0xff] }
  0x22   : > { %348 = vst.msk [vmem:[%s2125_s19 + $0x60] sm:$0xff] %vm335_vm0, %v2205_v14  ;;  %351 = vst.msk [vmem:[%s2125_s19 + $0x78] sm:$0xff] %vm335_vm0, %v2208_v15  ;;  %v2317_v32 = vld [vmem:[%s2119_s16 + $0xf0] sm:$0xff]  ;;  %v2320_v33 = vld [vmem:[%s2119_s16 + $0x108] sm:$0xff] }
  0x23   : > { %4086 = vst [vmem:[#allocation17_spill] sm:$0xff] %v2222_v16  ;;  %4087 = vst [vmem:[#allocation18_spill] sm:$0xff] %v2225_v17  ;;  %v2332_v34 = vld [vmem:[%s2119_s16 + $0x100] sm:$0xff]  ;;  %v2335_v35 = vld [vmem:[%s2119_s16 + $0x118] sm:$0xff] }
  0x24   : > { %4088 = vst [vmem:[#allocation19_spill] sm:$0xff] %v2228_v18  ;;  %350 = vst.msk [vmem:[%s2125_s19 + $0x70] sm:$0xff] %vm335_vm0, %v2222_v16  ;;  %v2338_v36 = vld [vmem:[%s2119_s16 + $0x110] sm:$0xff]  ;;  %v2350_v37 = vld [vmem:[%s2119_s16 + $0x128] sm:$0xff]  ;;  %511 = vperm.xlu1 %2053, %v2172_v9   ;;  %506 = vperm.xlu0 %2052, %v2184_v10  }
  0x25   : > { %353 = vst.msk [vmem:[%s2125_s19 + $0x88] sm:$0xff] %vm335_vm0, %v2225_v17  ;;  %352 = vst.msk [vmem:[%s2125_s19 + $0x80] sm:$0xff] %vm335_vm0, %v2228_v18  ;;  %v2353_v38 = vld [vmem:[%s2119_s16 + $0x120] sm:$0xff]  ;;  %v2356_v39 = vld [vmem:[%s2119_s16 + $0x138] sm:$0xff] }
  0x26   : > { %4089 = vst [vmem:[#allocation20_spill] sm:$0xff] %v2240_v19  ;;  %4090 = vst [vmem:[#allocation21_spill] sm:$0xff] %v2243_v20  ;;  %v2370_v40 = vld [vmem:[%s2119_s16 + $0x130] sm:$0xff]  ;;  %v2373_v41 = vld [vmem:[%s2119_s16 + $0x148] sm:$0xff] }
  0x27   : > { %4091 = vst [vmem:[#allocation22_spill] sm:$0xff] %v2246_v21  ;;  %355 = vst.msk [vmem:[%s2125_s19 + $0x98] sm:$0xff] %vm335_vm0, %v2240_v19  ;;  %v2376_v42 = vld [vmem:[%s2119_s16 + $0x140] sm:$0xff]  ;;  %v2388_v43 = vld [vmem:[%s2119_s16 + $0x158] sm:$0xff] }
  0x28   : > { %354 = vst.msk [vmem:[%s2125_s19 + $0x90] sm:$0xff] %vm335_vm0, %v2243_v20  ;;  %357 = vst.msk [vmem:[%s2125_s19 + $0xa8] sm:$0xff] %vm335_vm0, %v2246_v21  ;;  %v2391_v44 = vld [vmem:[%s2119_s16 + $0x150] sm:$0xff]  ;;  %v2394_v45 = vld [vmem:[%s2119_s16 + $0x168] sm:$0xff]  ;;  %521 = vperm.xlu1 %2053, %v2187_v11   ;;  %516 = vperm.xlu0 %2052, %v2190_v12  }
  0x29   : > { %4092 = vst [vmem:[#allocation23_spill] sm:$0xff] %v2258_v22  ;;  %4093 = vst [vmem:[#allocation24_spill] sm:$0xff] %v2261_v23  ;;  %v2406_v46 = vld [vmem:[%s2119_s16 + $0x160] sm:$0xff]  ;;  %v2409_v47 = vld [vmem:[%s2119_s16 + $0x178] sm:$0xff] }
  0x2a   : > { %4094 = vst [vmem:[#allocation25_spill] sm:$0xff] %v2264_v24  ;;  %356 = vst.msk [vmem:[%s2125_s19 + $0xa0] sm:$0xff] %vm335_vm0, %v2258_v22  ;;  %v2412_v48 = vld [vmem:[%s2119_s16 + $0x170] sm:$0xff]  ;;  %v2424_v49 = vld [vmem:[%s2119_s16 + $0x188] sm:$0xff] }
  0x2b   : > { %359 = vst.msk [vmem:[%s2125_s19 + $0xb8] sm:$0xff] %vm335_vm0, %v2261_v23  ;;  %358 = vst.msk [vmem:[%s2125_s19 + $0xb0] sm:$0xff] %vm335_vm0, %v2264_v24  ;;  %v2427_v50 = vld [vmem:[%s2119_s16 + $0x180] sm:$0xff]  ;;  %v2430_v51 = vld [vmem:[%s2119_s16 + $0x198] sm:$0xff] }
  0x2c   : > { %4095 = vst [vmem:[#allocation26_spill] sm:$0xff] %v2276_v25  ;;  %4096 = vst [vmem:[#allocation27_spill] sm:$0xff] %v2279_v26  ;;  %v2444_v52 = vld [vmem:[%s2119_s16 + $0x190] sm:$0xff]  ;;  %v2447_v53 = vld [vmem:[%s2119_s16 + $0x1a8] sm:$0xff]  ;;  %531 = vperm.xlu1 %2053, %v2202_v13   ;;  %526 = vperm.xlu0 %2052, %v2205_v14  }
  0x2d   : > { %4097 = vst [vmem:[#allocation28_spill] sm:$0xff] %v2282_v27  ;;  %361 = vst.msk [vmem:[%s2125_s19 + $0xc8] sm:$0xff] %vm335_vm0, %v2276_v25  ;;  %v2450_v54 = vld [vmem:[%s2119_s16 + $0x1a0] sm:$0xff]  ;;  %v2462_v55 = vld [vmem:[%s2119_s16 + $0x1b8] sm:$0xff] }
  0x2e   : > { %360 = vst.msk [vmem:[%s2125_s19 + $0xc0] sm:$0xff] %vm335_vm0, %v2279_v26  ;;  %363 = vst.msk [vmem:[%s2125_s19 + $0xd8] sm:$0xff] %vm335_vm0, %v2282_v27  ;;  %v2465_v56 = vld [vmem:[%s2119_s16 + $0x1b0] sm:$0xff]  ;;  %v2468_v57 = vld [vmem:[%s2119_s16 + $0x1c8] sm:$0xff] }
  0x2f   : > { %4098 = vst [vmem:[#allocation29_spill] sm:$0xff] %v2296_v28  ;;  %4099 = vst [vmem:[#allocation30_spill] sm:$0xff] %v2299_v29  ;;  %v2480_v58 = vld [vmem:[%s2119_s16 + $0x1c0] sm:$0xff]  ;;  %v2483_v59 = vld [vmem:[%s2119_s16 + $0x1d8] sm:$0xff] }
  0x30   : > { %4100 = vst [vmem:[#allocation31_spill] sm:$0xff] %v2302_v30  ;;  %362 = vst.msk [vmem:[%s2125_s19 + $0xd0] sm:$0xff] %vm335_vm0, %v2296_v28  ;;  %v2486_v60 = vld [vmem:[%s2119_s16 + $0x1d0] sm:$0xff]  ;;  %v2498_v61 = vld [vmem:[%s2119_s16 + $0x1e8] sm:$0xff]  ;;  %541 = vperm.xlu1 %2053, %v2208_v15   ;;  %536 = vperm.xlu0 %2052, %v2222_v16  }
  0x31   : > { %365 = vst.msk [vmem:[%s2125_s19 + $0xe8] sm:$0xff] %vm335_vm0, %v2299_v29  ;;  %364 = vst.msk [vmem:[%s2125_s19 + $0xe0] sm:$0xff] %vm335_vm0, %v2302_v30  ;;  %v2501_v62 = vld [vmem:[%s2119_s16 + $0x1e0] sm:$0xff]  ;;  %v2504_v63 = vld [vmem:[%s2119_s16 + $0x1f8] sm:$0xff] }
  0x32   : > { %4101 = vst [vmem:[#allocation32_spill] sm:$0xff] %v2314_v31  ;;  %4102 = vst [vmem:[#allocation33_spill] sm:$0xff] %v2317_v32  ;;  %v2518_v0 = vld [vmem:[%s2119_s16 + $0x1f0] sm:$0xff]  ;;  %v2521_v11 = vld [vmem:[%s2119_s16 + $0x208] sm:$0xff] }
  0x33   : > { %4103 = vst [vmem:[#allocation34_spill] sm:$0xff] %v2320_v33  ;;  %367 = vst.msk [vmem:[%s2125_s19 + $0xf8] sm:$0xff] %vm335_vm0, %v2314_v31  ;;  %v2524_v12 = vld [vmem:[%s2119_s16 + $0x200] sm:$0xff]  ;;  %v2536_v10 = vld [vmem:[%s2119_s16 + $0x218] sm:$0xff] }
  0x34   : > { %366 = vst.msk [vmem:[%s2125_s19 + $0xf0] sm:$0xff] %vm335_vm0, %v2317_v32  ;;  %369 = vst.msk [vmem:[%s2125_s19 + $0x108] sm:$0xff] %vm335_vm0, %v2320_v33  ;;  %v2539_v9 = vld [vmem:[%s2119_s16 + $0x210] sm:$0xff]  ;;  %v2542_v8 = vld [vmem:[%s2119_s16 + $0x228] sm:$0xff]  ;;  %551 = vperm.xlu1 %2053, %v2225_v17   ;;  %546 = vperm.xlu0 %2052, %v2228_v18  }
  0x35   : > { %4104 = vst [vmem:[#allocation35_spill] sm:$0xff] %v2332_v34  ;;  %4105 = vst [vmem:[#allocation36_spill] sm:$0xff] %v2335_v35  ;;  %v2554_v7 = vld [vmem:[%s2119_s16 + $0x220] sm:$0xff]  ;;  %v2557_v6 = vld [vmem:[%s2119_s16 + $0x238] sm:$0xff] }
  0x36   : > { %4106 = vst [vmem:[#allocation37_spill] sm:$0xff] %v2338_v36  ;;  %368 = vst.msk [vmem:[%s2125_s19 + $0x100] sm:$0xff] %vm335_vm0, %v2332_v34  ;;  %v2560_v5 = vld [vmem:[%s2119_s16 + $0x230] sm:$0xff]  ;;  %v2572_v3 = vld [vmem:[%s2119_s16 + $0x248] sm:$0xff] }
  0x37   : > { %371 = vst.msk [vmem:[%s2125_s19 + $0x118] sm:$0xff] %vm335_vm0, %v2335_v35  ;;  %370 = vst.msk [vmem:[%s2125_s19 + $0x110] sm:$0xff] %vm335_vm0, %v2338_v36  ;;  %v2575_v1 = vld [vmem:[%s2119_s16 + $0x240] sm:$0xff]  ;;  %v2578_v4 = vld [vmem:[%s2119_s16 + $0x258] sm:$0xff] }
  0x38   : > { %4107 = vst [vmem:[#allocation38_spill] sm:$0xff] %v2350_v37  ;;  %4108 = vst [vmem:[#allocation39_spill] sm:$0xff] %v2353_v38  ;;  %v2592_v2 = vld [vmem:[%s2119_s16 + $0x250] sm:$0xff]  ;;  %v2598_v13 = vld [vmem:[%s2119_s16 + $0x260] sm:$0xff]  ;;  %561 = vperm.xlu1 %2053, %v2240_v19   ;;  %556 = vperm.xlu0 %2052, %v2243_v20  }
  0x39   : > { %4109 = vst [vmem:[#allocation40_spill] sm:$0xff] %v2356_v39  ;;  %373 = vst.msk [vmem:[%s2125_s19 + $0x128] sm:$0xff] %vm335_vm0, %v2350_v37  ;;  %v2610_v14 = vld [vmem:[%s2119_s16 + $0x278] sm:$0xff]  ;;  %v2641_v15 = vld [vmem:[%s2119_s16 + $0x290] sm:$0xff] }
  0x3a   : > { %372 = vst.msk [vmem:[%s2125_s19 + $0x120] sm:$0xff] %vm335_vm0, %v2353_v38  ;;  %375 = vst.msk [vmem:[%s2125_s19 + $0x138] sm:$0xff] %vm335_vm0, %v2356_v39  ;;  %v2638_v16 = vld [vmem:[%s2119_s16 + $0x298] sm:$0xff]  ;;  %v2652_v18 = vld [vmem:[%s2119_s16 + $0x2a8] sm:$0xff] }
  0x3b   : > { %4110 = vst [vmem:[#allocation41_spill] sm:$0xff] %v2370_v40  ;;  %4111 = vst [vmem:[#allocation42_spill] sm:$0xff] %v2373_v41  ;;  %v2655_v17 = vld [vmem:[%s2119_s16 + $0x2a0] sm:$0xff]  ;;  %v2666_v20 = vld [vmem:[%s2119_s16 + $0x2b8] sm:$0xff] }
  0x3c   : > { %4112 = vst [vmem:[#allocation43_spill] sm:$0xff] %v2376_v42  ;;  %374 = vst.msk [vmem:[%s2125_s19 + $0x130] sm:$0xff] %vm335_vm0, %v2370_v40  ;;  %571 = vperm.xlu1 %2053, %v2246_v21   ;;  %566 = vperm.xlu0 %2052, %v2258_v22   ;;  %v2669_v19 = vld [vmem:[%s2119_s16 + $0x2b0] sm:$0xff]  ;;  %v2680_v22 = vld [vmem:[%s2119_s16 + $0x2c8] sm:$0xff] }
  0x3d   : > { %377 = vst.msk [vmem:[%s2125_s19 + $0x148] sm:$0xff] %vm335_vm0, %v2373_v41  ;;  %376 = vst.msk [vmem:[%s2125_s19 + $0x140] sm:$0xff] %vm335_vm0, %v2376_v42  ;;  %v2683_v21 = vld [vmem:[%s2119_s16 + $0x2c0] sm:$0xff] }
  0x3e   : > { %4113 = vst [vmem:[#allocation44_spill] sm:$0xff] %v2388_v43  ;;  %4114 = vst [vmem:[#allocation45_spill] sm:$0xff] %v2391_v44 }
  0x3f   : > { %4115 = vst [vmem:[#allocation46_spill] sm:$0xff] %v2394_v45  ;;  %379 = vst.msk [vmem:[%s2125_s19 + $0x158] sm:$0xff] %vm335_vm0, %v2388_v43 }
  0x40   : > { %378 = vst.msk [vmem:[%s2125_s19 + $0x150] sm:$0xff] %vm335_vm0, %v2391_v44  ;;  %381 = vst.msk [vmem:[%s2125_s19 + $0x168] sm:$0xff] %vm335_vm0, %v2394_v45  ;;  %581 = vperm.xlu1 %2053, %v2261_v23   ;;  %576 = vperm.xlu0 %2052, %v2264_v24   ;;  %v2694_v24 = vld [vmem:[%s2119_s16 + $0x2d8] sm:$0xff]  ;;  %v2697_v23 = vld [vmem:[%s2119_s16 + $0x2d0] sm:$0xff] }
  0x41   : > { %4116 = vst [vmem:[#allocation47_spill] sm:$0xff] %v2406_v46  ;;  %4117 = vst [vmem:[#allocation48_spill] sm:$0xff] %v2409_v47 }
  0x42   : > { %4118 = vst [vmem:[#allocation49_spill] sm:$0xff] %v2412_v48  ;;  %380 = vst.msk [vmem:[%s2125_s19 + $0x160] sm:$0xff] %vm335_vm0, %v2406_v46 }
  0x43   : > { %383 = vst.msk [vmem:[%s2125_s19 + $0x178] sm:$0xff] %vm335_vm0, %v2409_v47  ;;  %382 = vst.msk [vmem:[%s2125_s19 + $0x170] sm:$0xff] %vm335_vm0, %v2412_v48 }
  0x44   : > { %4119 = vst [vmem:[#allocation50_spill] sm:$0xff] %v2424_v49  ;;  %4120 = vst [vmem:[#allocation51_spill] sm:$0xff] %v2427_v50  ;;  %591 = vperm.xlu1 %2053, %v2276_v25   ;;  %586 = vperm.xlu0 %2052, %v2279_v26   ;;  %v2708_v26 = vld [vmem:[%s2119_s16 + $0x2e8] sm:$0xff]  ;;  %v2711_v25 = vld [vmem:[%s2119_s16 + $0x2e0] sm:$0xff] }
  0x45   : > { %4121 = vst [vmem:[#allocation52_spill] sm:$0xff] %v2430_v51  ;;  %385 = vst.msk [vmem:[%s2125_s19 + $0x188] sm:$0xff] %vm335_vm0, %v2424_v49 }
  0x46   : > { %384 = vst.msk [vmem:[%s2125_s19 + $0x180] sm:$0xff] %vm335_vm0, %v2427_v50  ;;  %387 = vst.msk [vmem:[%s2125_s19 + $0x198] sm:$0xff] %vm335_vm0, %v2430_v51 }
  0x47   : > { %4122 = vst [vmem:[#allocation53_spill] sm:$0xff] %v2444_v52  ;;  %4123 = vst [vmem:[#allocation54_spill] sm:$0xff] %v2447_v53 }
  0x48   : > { %4124 = vst [vmem:[#allocation55_spill] sm:$0xff] %v2450_v54  ;;  %386 = vst.msk [vmem:[%s2125_s19 + $0x190] sm:$0xff] %vm335_vm0, %v2444_v52  ;;  %601 = vperm.xlu1 %2053, %v2282_v27   ;;  %596 = vperm.xlu0 %2052, %v2296_v28   ;;  %v2722_v28 = vld [vmem:[%s2119_s16 + $0x2f8] sm:$0xff]  ;;  %v2725_v27 = vld [vmem:[%s2119_s16 + $0x2f0] sm:$0xff] }
  0x49   : > { %389 = vst.msk [vmem:[%s2125_s19 + $0x1a8] sm:$0xff] %vm335_vm0, %v2447_v53  ;;  %388 = vst.msk [vmem:[%s2125_s19 + $0x1a0] sm:$0xff] %vm335_vm0, %v2450_v54 }
  0x4a   : > { %4125 = vst [vmem:[#allocation56_spill] sm:$0xff] %v2462_v55  ;;  %4126 = vst [vmem:[#allocation57_spill] sm:$0xff] %v2465_v56 }
  0x4b   : > { %4127 = vst [vmem:[#allocation58_spill] sm:$0xff] %v2468_v57  ;;  %391 = vst.msk [vmem:[%s2125_s19 + $0x1b8] sm:$0xff] %vm335_vm0, %v2462_v55 }
  0x4c   : > { %390 = vst.msk [vmem:[%s2125_s19 + $0x1b0] sm:$0xff] %vm335_vm0, %v2465_v56  ;;  %393 = vst.msk [vmem:[%s2125_s19 + $0x1c8] sm:$0xff] %vm335_vm0, %v2468_v57  ;;  %611 = vperm.xlu1 %2053, %v2299_v29   ;;  %606 = vperm.xlu0 %2052, %v2302_v30   ;;  %v2736_v30 = vld [vmem:[%s2119_s16 + $0x308] sm:$0xff]  ;;  %v2739_v29 = vld [vmem:[%s2119_s16 + $0x300] sm:$0xff] }
  0x4d   : > { %4128 = vst [vmem:[#allocation59_spill] sm:$0xff] %v2480_v58  ;;  %4129 = vst [vmem:[#allocation60_spill] sm:$0xff] %v2483_v59 }
  0x4e   : > { %4130 = vst [vmem:[#allocation61_spill] sm:$0xff] %v2486_v60  ;;  %392 = vst.msk [vmem:[%s2125_s19 + $0x1c0] sm:$0xff] %vm335_vm0, %v2480_v58 }
  0x4f   : > { %395 = vst.msk [vmem:[%s2125_s19 + $0x1d8] sm:$0xff] %vm335_vm0, %v2483_v59  ;;  %394 = vst.msk [vmem:[%s2125_s19 + $0x1d0] sm:$0xff] %vm335_vm0, %v2486_v60 }
  0x50   : > { %4131 = vst [vmem:[#allocation62_spill] sm:$0xff] %v2498_v61  ;;  %4132 = vst [vmem:[#allocation63_spill] sm:$0xff] %v2501_v62  ;;  %621 = vperm.xlu1 %2053, %v2314_v31   ;;  %616 = vperm.xlu0 %2052, %v2317_v32   ;;  %v2750_v32 = vld [vmem:[%s2119_s16 + $0x318] sm:$0xff]  ;;  %v2753_v31 = vld [vmem:[%s2119_s16 + $0x310] sm:$0xff] }
  0x51   : > { %4133 = vst [vmem:[#allocation64_spill] sm:$0xff] %v2504_v63  ;;  %397 = vst.msk [vmem:[%s2125_s19 + $0x1e8] sm:$0xff] %vm335_vm0, %v2498_v61 }
  0x52   : > { %396 = vst.msk [vmem:[%s2125_s19 + $0x1e0] sm:$0xff] %vm335_vm0, %v2501_v62  ;;  %399 = vst.msk [vmem:[%s2125_s19 + $0x1f8] sm:$0xff] %vm335_vm0, %v2504_v63 }
  0x53   : > { %4134 = vst [vmem:[#allocation65_spill] sm:$0xff] %v2518_v0  ;;  %4135 = vst [vmem:[#allocation66_spill] sm:$0xff] %v2521_v11 }
  0x54   : > { %4136 = vst [vmem:[#allocation67_spill] sm:$0xff] %v2524_v12  ;;  %398 = vst.msk [vmem:[%s2125_s19 + $0x1f0] sm:$0xff] %vm335_vm0, %v2518_v0  ;;  %631 = vperm.xlu1 %2053, %v2320_v33   ;;  %626 = vperm.xlu0 %2052, %v2332_v34   ;;  %v2764_v34 = vld [vmem:[%s2119_s16 + $0x328] sm:$0xff]  ;;  %v2767_v33 = vld [vmem:[%s2119_s16 + $0x320] sm:$0xff] }
  0x55   : > { %401 = vst.msk [vmem:[%s2125_s19 + $0x208] sm:$0xff] %vm335_vm0, %v2521_v11  ;;  %400 = vst.msk [vmem:[%s2125_s19 + $0x200] sm:$0xff] %vm335_vm0, %v2524_v12 }
  0x56   : > { %4137 = vst [vmem:[#allocation68_spill] sm:$0xff] %v2536_v10  ;;  %4138 = vst [vmem:[#allocation69_spill] sm:$0xff] %v2539_v9 }
  0x57   : > { %4139 = vst [vmem:[#allocation70_spill] sm:$0xff] %v2542_v8  ;;  %403 = vst.msk [vmem:[%s2125_s19 + $0x218] sm:$0xff] %vm335_vm0, %v2536_v10 }
  0x58   : > { %402 = vst.msk [vmem:[%s2125_s19 + $0x210] sm:$0xff] %vm335_vm0, %v2539_v9  ;;  %405 = vst.msk [vmem:[%s2125_s19 + $0x228] sm:$0xff] %vm335_vm0, %v2542_v8  ;;  %641 = vperm.xlu1 %2053, %v2335_v35   ;;  %636 = vperm.xlu0 %2052, %v2338_v36   ;;  %v2778_v36 = vld [vmem:[%s2119_s16 + $0x338] sm:$0xff]  ;;  %v2781_v35 = vld [vmem:[%s2119_s16 + $0x330] sm:$0xff] }
  0x59   : > { %4140 = vst [vmem:[#allocation71_spill] sm:$0xff] %v2554_v7  ;;  %4141 = vst [vmem:[#allocation72_spill] sm:$0xff] %v2557_v6 }
  0x5a   : > { %4142 = vst [vmem:[#allocation73_spill] sm:$0xff] %v2560_v5  ;;  %404 = vst.msk [vmem:[%s2125_s19 + $0x220] sm:$0xff] %vm335_vm0, %v2554_v7 }
  0x5b   : > { %407 = vst.msk [vmem:[%s2125_s19 + $0x238] sm:$0xff] %vm335_vm0, %v2557_v6  ;;  %406 = vst.msk [vmem:[%s2125_s19 + $0x230] sm:$0xff] %vm335_vm0, %v2560_v5  ;;  %v2595_v5 = vld [vmem:[%s2119_s16 + $0x268] sm:$0xff] }
  0x5c   : > { %4143 = vst [vmem:[#allocation74_spill] sm:$0xff] %v2572_v3  ;;  %4144 = vst [vmem:[#allocation75_spill] sm:$0xff] %v2575_v1  ;;  %651 = vperm.xlu1 %2053, %v2350_v37   ;;  %646 = vperm.xlu0 %2052, %v2353_v38   ;;  %v2792_v38 = vld [vmem:[%s2119_s16 + $0x348] sm:$0xff]  ;;  %v2795_v37 = vld [vmem:[%s2119_s16 + $0x340] sm:$0xff] }
  0x5d   : > { %4145 = vst [vmem:[#allocation76_spill] sm:$0xff] %v2578_v4  ;;  %409 = vst.msk [vmem:[%s2125_s19 + $0x248] sm:$0xff] %vm335_vm0, %v2572_v3 }
  0x5e   : > { %408 = vst.msk [vmem:[%s2125_s19 + $0x240] sm:$0xff] %vm335_vm0, %v2575_v1  ;;  %411 = vst.msk [vmem:[%s2125_s19 + $0x258] sm:$0xff] %vm335_vm0, %v2578_v4  ;;  %v2613_v4 = vld [vmem:[%s2119_s16 + $0x270] sm:$0xff] }
  0x5f   : > { %4146 = vst [vmem:[#allocation77_spill] sm:$0xff] %v2592_v2  ;;  %4147 = vst [vmem:[#allocation78_spill] sm:$0xff] %v2595_v5 }
  0x60   : > { %4148 = vst [vmem:[#allocation79_spill] sm:$0xff] %v2598_v13  ;;  %410 = vst.msk [vmem:[%s2125_s19 + $0x250] sm:$0xff] %vm335_vm0, %v2592_v2  ;;  %661 = vperm.xlu1 %2053, %v2356_v39   ;;  %656 = vperm.xlu0 %2052, %v2370_v40   ;;  %v2806_v40 = vld [vmem:[%s2119_s16 + $0x358] sm:$0xff]  ;;  %v2809_v39 = vld [vmem:[%s2119_s16 + $0x350] sm:$0xff] }
  0x61   : > { %413 = vst.msk [vmem:[%s2125_s19 + $0x268] sm:$0xff] %vm335_vm0, %v2595_v5  ;;  %412 = vst.msk [vmem:[%s2125_s19 + $0x260] sm:$0xff] %vm335_vm0, %v2598_v13  ;;  %v2624_v5 = vld [vmem:[%s2119_s16 + $0x288] sm:$0xff]  ;;  %v2627_v13 = vld [vmem:[%s2119_s16 + $0x280] sm:$0xff] }
  0x62   : > { %4149 = vst [vmem:[#allocation80_spill] sm:$0xff] %v2610_v14  ;;  %4150 = vst [vmem:[#allocation81_spill] sm:$0xff] %v2613_v4 }
  0x63   : > { %415 = vst.msk [vmem:[%s2125_s19 + $0x278] sm:$0xff] %vm335_vm0, %v2610_v14  ;;  %414 = vst.msk [vmem:[%s2125_s19 + $0x270] sm:$0xff] %vm335_vm0, %v2613_v4 }
  0x64   : > { %4151 = vst [vmem:[#allocation82_spill] sm:$0xff] %v2624_v5  ;;  %4152 = vst [vmem:[#allocation83_spill] sm:$0xff] %v2627_v13  ;;  %671 = vperm.xlu1 %2053, %v2373_v41   ;;  %666 = vperm.xlu0 %2052, %v2376_v42   ;;  %v2820_v42 = vld [vmem:[%s2119_s16 + $0x368] sm:$0xff]  ;;  %v2823_v41 = vld [vmem:[%s2119_s16 + $0x360] sm:$0xff] }
  0x65   : > { %417 = vst.msk [vmem:[%s2125_s19 + $0x288] sm:$0xff] %vm335_vm0, %v2624_v5  ;;  %416 = vst.msk [vmem:[%s2125_s19 + $0x280] sm:$0xff] %vm335_vm0, %v2627_v13 }
  0x66   : > { %4153 = vst [vmem:[#allocation84_spill] sm:$0xff] %v2638_v16  ;;  %4154 = vst [vmem:[#allocation85_spill] sm:$0xff] %v2641_v15 }
  0x67   : > { %419 = vst.msk [vmem:[%s2125_s19 + $0x298] sm:$0xff] %vm335_vm0, %v2638_v16  ;;  %418 = vst.msk [vmem:[%s2125_s19 + $0x290] sm:$0xff] %vm335_vm0, %v2641_v15 }
  0x68   : > { %4155 = vst [vmem:[#allocation86_spill] sm:$0xff] %v2652_v18  ;;  %4156 = vst [vmem:[#allocation87_spill] sm:$0xff] %v2655_v17  ;;  %681 = vperm.xlu1 %2053, %v2388_v43   ;;  %676 = vperm.xlu0 %2052, %v2391_v44   ;;  %v2834_v44 = vld [vmem:[%s2119_s16 + $0x378] sm:$0xff]  ;;  %v2837_v43 = vld [vmem:[%s2119_s16 + $0x370] sm:$0xff] }
  0x69   : > { %421 = vst.msk [vmem:[%s2125_s19 + $0x2a8] sm:$0xff] %vm335_vm0, %v2652_v18  ;;  %420 = vst.msk [vmem:[%s2125_s19 + $0x2a0] sm:$0xff] %vm335_vm0, %v2655_v17 }
  0x6a   : > { %4157 = vst [vmem:[#allocation88_spill] sm:$0xff] %v2666_v20  ;;  %4158 = vst [vmem:[#allocation89_spill] sm:$0xff] %v2669_v19 }
  0x6b   : > { %423 = vst.msk [vmem:[%s2125_s19 + $0x2b8] sm:$0xff] %vm335_vm0, %v2666_v20  ;;  %422 = vst.msk [vmem:[%s2125_s19 + $0x2b0] sm:$0xff] %vm335_vm0, %v2669_v19 }
  0x6c   : > { %4159 = vst [vmem:[#allocation90_spill] sm:$0xff] %v2680_v22  ;;  %4160 = vst [vmem:[#allocation91_spill] sm:$0xff] %v2683_v21  ;;  %691 = vperm.xlu1 %2053, %v2394_v45   ;;  %686 = vperm.xlu0 %2052, %v2406_v46   ;;  %v2848_v46 = vld [vmem:[%s2119_s16 + $0x388] sm:$0xff]  ;;  %v2851_v45 = vld [vmem:[%s2119_s16 + $0x380] sm:$0xff] }
  0x6d   : > { %425 = vst.msk [vmem:[%s2125_s19 + $0x2c8] sm:$0xff] %vm335_vm0, %v2680_v22  ;;  %424 = vst.msk [vmem:[%s2125_s19 + $0x2c0] sm:$0xff] %vm335_vm0, %v2683_v21 }
  0x6e   : > { %4161 = vst [vmem:[#allocation92_spill] sm:$0xff] %v2694_v24  ;;  %4162 = vst [vmem:[#allocation93_spill] sm:$0xff] %v2697_v23 }
  0x6f   : > { %427 = vst.msk [vmem:[%s2125_s19 + $0x2d8] sm:$0xff] %vm335_vm0, %v2694_v24  ;;  %426 = vst.msk [vmem:[%s2125_s19 + $0x2d0] sm:$0xff] %vm335_vm0, %v2697_v23 }
  0x70   : > { %4163 = vst [vmem:[#allocation94_spill] sm:$0xff] %v2708_v26  ;;  %4164 = vst [vmem:[#allocation95_spill] sm:$0xff] %v2711_v25  ;;  %701 = vperm.xlu1 %2053, %v2409_v47   ;;  %696 = vperm.xlu0 %2052, %v2412_v48   ;;  %v2862_v48 = vld [vmem:[%s2119_s16 + $0x398] sm:$0xff]  ;;  %v2865_v47 = vld [vmem:[%s2119_s16 + $0x390] sm:$0xff] }
  0x71   : > { %429 = vst.msk [vmem:[%s2125_s19 + $0x2e8] sm:$0xff] %vm335_vm0, %v2708_v26  ;;  %428 = vst.msk [vmem:[%s2125_s19 + $0x2e0] sm:$0xff] %vm335_vm0, %v2711_v25 }
  0x72   : > { %4165 = vst [vmem:[#allocation96_spill] sm:$0xff] %v2722_v28  ;;  %4166 = vst [vmem:[#allocation97_spill] sm:$0xff] %v2725_v27 }
  0x73   : > { %431 = vst.msk [vmem:[%s2125_s19 + $0x2f8] sm:$0xff] %vm335_vm0, %v2722_v28  ;;  %430 = vst.msk [vmem:[%s2125_s19 + $0x2f0] sm:$0xff] %vm335_vm0, %v2725_v27 }
  0x74   : > { %4167 = vst [vmem:[#allocation98_spill] sm:$0xff] %v2736_v30  ;;  %4168 = vst [vmem:[#allocation99_spill] sm:$0xff] %v2739_v29  ;;  %711 = vperm.xlu1 %2053, %v2424_v49   ;;  %706 = vperm.xlu0 %2052, %v2427_v50   ;;  %v2876_v50 = vld [vmem:[%s2119_s16 + $0x3a8] sm:$0xff]  ;;  %v2879_v49 = vld [vmem:[%s2119_s16 + $0x3a0] sm:$0xff] }
  0x75   : > { %433 = vst.msk [vmem:[%s2125_s19 + $0x308] sm:$0xff] %vm335_vm0, %v2736_v30  ;;  %432 = vst.msk [vmem:[%s2125_s19 + $0x300] sm:$0xff] %vm335_vm0, %v2739_v29 }
  0x76   : > { %4169 = vst [vmem:[#allocation100_spill] sm:$0xff] %v2750_v32  ;;  %4170 = vst [vmem:[#allocation101_spill] sm:$0xff] %v2753_v31 }
  0x77   : > { %435 = vst.msk [vmem:[%s2125_s19 + $0x318] sm:$0xff] %vm335_vm0, %v2750_v32  ;;  %434 = vst.msk [vmem:[%s2125_s19 + $0x310] sm:$0xff] %vm335_vm0, %v2753_v31 }
  0x78   : > { %4171 = vst [vmem:[#allocation102_spill] sm:$0xff] %v2764_v34  ;;  %4172 = vst [vmem:[#allocation103_spill] sm:$0xff] %v2767_v33  ;;  %721 = vperm.xlu1 %2053, %v2430_v51   ;;  %716 = vperm.xlu0 %2052, %v2444_v52   ;;  %v2890_v52 = vld [vmem:[%s2119_s16 + $0x3b8] sm:$0xff]  ;;  %v2893_v51 = vld [vmem:[%s2119_s16 + $0x3b0] sm:$0xff] }
  0x79   : > { %437 = vst.msk [vmem:[%s2125_s19 + $0x328] sm:$0xff] %vm335_vm0, %v2764_v34  ;;  %436 = vst.msk [vmem:[%s2125_s19 + $0x320] sm:$0xff] %vm335_vm0, %v2767_v33 }
  0x7a   : > { %4173 = vst [vmem:[#allocation104_spill] sm:$0xff] %v2778_v36  ;;  %4174 = vst [vmem:[#allocation105_spill] sm:$0xff] %v2781_v35 }
  0x7b   : > { %439 = vst.msk [vmem:[%s2125_s19 + $0x338] sm:$0xff] %vm335_vm0, %v2778_v36  ;;  %438 = vst.msk [vmem:[%s2125_s19 + $0x330] sm:$0xff] %vm335_vm0, %v2781_v35 }
  0x7c   : > { %4175 = vst [vmem:[#allocation106_spill] sm:$0xff] %v2792_v38  ;;  %4176 = vst [vmem:[#allocation107_spill] sm:$0xff] %v2795_v37  ;;  %731 = vperm.xlu1 %2053, %v2447_v53   ;;  %726 = vperm.xlu0 %2052, %v2450_v54   ;;  %v2904_v54 = vld [vmem:[%s2119_s16 + $0x3c8] sm:$0xff]  ;;  %v2907_v53 = vld [vmem:[%s2119_s16 + $0x3c0] sm:$0xff] }
  0x7d   : > { %441 = vst.msk [vmem:[%s2125_s19 + $0x348] sm:$0xff] %vm335_vm0, %v2792_v38  ;;  %440 = vst.msk [vmem:[%s2125_s19 + $0x340] sm:$0xff] %vm335_vm0, %v2795_v37 }
  0x7e   : > { %4177 = vst [vmem:[#allocation108_spill] sm:$0xff] %v2806_v40  ;;  %4178 = vst [vmem:[#allocation109_spill] sm:$0xff] %v2809_v39 }
  0x7f   : > { %443 = vst.msk [vmem:[%s2125_s19 + $0x358] sm:$0xff] %vm335_vm0, %v2806_v40  ;;  %442 = vst.msk [vmem:[%s2125_s19 + $0x350] sm:$0xff] %vm335_vm0, %v2809_v39 }
  0x80   : > { %4179 = vst [vmem:[#allocation110_spill] sm:$0xff] %v2820_v42  ;;  %4180 = vst [vmem:[#allocation111_spill] sm:$0xff] %v2823_v41  ;;  %741 = vperm.xlu1 %2053, %v2462_v55   ;;  %736 = vperm.xlu0 %2052, %v2465_v56   ;;  %v2918_v56 = vld [vmem:[%s2119_s16 + $0x3d8] sm:$0xff]  ;;  %v2921_v55 = vld [vmem:[%s2119_s16 + $0x3d0] sm:$0xff] }
  0x81   : > { %445 = vst.msk [vmem:[%s2125_s19 + $0x368] sm:$0xff] %vm335_vm0, %v2820_v42  ;;  %444 = vst.msk [vmem:[%s2125_s19 + $0x360] sm:$0xff] %vm335_vm0, %v2823_v41 }
  0x82   : > { %4181 = vst [vmem:[#allocation112_spill] sm:$0xff] %v2834_v44  ;;  %4182 = vst [vmem:[#allocation113_spill] sm:$0xff] %v2837_v43 }
  0x83   : > { %447 = vst.msk [vmem:[%s2125_s19 + $0x378] sm:$0xff] %vm335_vm0, %v2834_v44  ;;  %446 = vst.msk [vmem:[%s2125_s19 + $0x370] sm:$0xff] %vm335_vm0, %v2837_v43 }
  0x84   : > { %4183 = vst [vmem:[#allocation114_spill] sm:$0xff] %v2848_v46  ;;  %4184 = vst [vmem:[#allocation115_spill] sm:$0xff] %v2851_v45  ;;  %751 = vperm.xlu1 %2053, %v2468_v57   ;;  %746 = vperm.xlu0 %2052, %v2480_v58   ;;  %v2932_v58 = vld [vmem:[%s2119_s16 + $0x3e8] sm:$0xff]  ;;  %v2935_v57 = vld [vmem:[%s2119_s16 + $0x3e0] sm:$0xff] }
  0x85   : > { %449 = vst.msk [vmem:[%s2125_s19 + $0x388] sm:$0xff] %vm335_vm0, %v2848_v46  ;;  %448 = vst.msk [vmem:[%s2125_s19 + $0x380] sm:$0xff] %vm335_vm0, %v2851_v45 }
  0x86   : > { %4185 = vst [vmem:[#allocation116_spill] sm:$0xff] %v2862_v48  ;;  %4186 = vst [vmem:[#allocation117_spill] sm:$0xff] %v2865_v47 }
  0x87   : > { %451 = vst.msk [vmem:[%s2125_s19 + $0x398] sm:$0xff] %vm335_vm0, %v2862_v48  ;;  %450 = vst.msk [vmem:[%s2125_s19 + $0x390] sm:$0xff] %vm335_vm0, %v2865_v47 }
  0x88   : > { %4187 = vst [vmem:[#allocation118_spill] sm:$0xff] %v2876_v50  ;;  %4188 = vst [vmem:[#allocation119_spill] sm:$0xff] %v2879_v49  ;;  %761 = vperm.xlu1 %2053, %v2483_v59   ;;  %756 = vperm.xlu0 %2052, %v2486_v60   ;;  %v2946_v60 = vld [vmem:[%s2119_s16 + $0x3f8] sm:$0xff]  ;;  %v2949_v59 = vld [vmem:[%s2119_s16 + $0x3f0] sm:$0xff] }
  0x89   : > { %453 = vst.msk [vmem:[%s2125_s19 + $0x3a8] sm:$0xff] %vm335_vm0, %v2876_v50  ;;  %452 = vst.msk [vmem:[%s2125_s19 + $0x3a0] sm:$0xff] %vm335_vm0, %v2879_v49 }
  0x8a   : > { %4189 = vst [vmem:[#allocation120_spill] sm:$0xff] %v2890_v52  ;;  %4190 = vst [vmem:[#allocation121_spill] sm:$0xff] %v2893_v51 }
  0x8b   : > { %455 = vst.msk [vmem:[%s2125_s19 + $0x3b8] sm:$0xff] %vm335_vm0, %v2890_v52  ;;  %454 = vst.msk [vmem:[%s2125_s19 + $0x3b0] sm:$0xff] %vm335_vm0, %v2893_v51 }
  0x8c   : > { %4191 = vst [vmem:[#allocation122_spill] sm:$0xff] %v2904_v54  ;;  %4192 = vst [vmem:[#allocation123_spill] sm:$0xff] %v2907_v53  ;;  %771 = vperm.xlu1 %2053, %v2498_v61   ;;  %766 = vperm.xlu0 %2052, %v2501_v62  }
  0x8d   : > { %457 = vst.msk [vmem:[%s2125_s19 + $0x3c8] sm:$0xff] %vm335_vm0, %v2904_v54  ;;  %456 = vst.msk [vmem:[%s2125_s19 + $0x3c0] sm:$0xff] %vm335_vm0, %v2907_v53 }
  0x8e   : > { %4193 = vst [vmem:[#allocation124_spill] sm:$0xff] %v2918_v56  ;;  %4194 = vst [vmem:[#allocation125_spill] sm:$0xff] %v2921_v55 }
  0x8f   : > { %459 = vst.msk [vmem:[%s2125_s19 + $0x3d8] sm:$0xff] %vm335_vm0, %v2918_v56  ;;  %458 = vst.msk [vmem:[%s2125_s19 + $0x3d0] sm:$0xff] %vm335_vm0, %v2921_v55 }
  0x90   : > { %4195 = vst [vmem:[#allocation126_spill] sm:$0xff] %v2932_v58  ;;  %4196 = vst [vmem:[#allocation127_spill] sm:$0xff] %v2935_v57  ;;  %781 = vperm.xlu1 %2053, %v2504_v63   ;;  %776 = vperm.xlu0 %2052, %v2518_v0  }
  0x91   : > { %461 = vst.msk [vmem:[%s2125_s19 + $0x3e8] sm:$0xff] %vm335_vm0, %v2932_v58  ;;  %460 = vst.msk [vmem:[%s2125_s19 + $0x3e0] sm:$0xff] %vm335_vm0, %v2935_v57 }
  0x92   : > { %4197 = vst [vmem:[#allocation128_spill] sm:$0xff] %v2946_v60  ;;  %4198 = vst [vmem:[#allocation129_spill] sm:$0xff] %v2949_v59 }
  0x93   : > { %463 = vst.msk [vmem:[%s2125_s19 + $0x3f8] sm:$0xff] %vm335_vm0, %v2946_v60  ;;  %462 = vst.msk [vmem:[%s2125_s19 + $0x3f0] sm:$0xff] %vm335_vm0, %v2949_v59  ;;  %v2959_v62 = vpop.permute.xlu1 %476  ;;  %v2961_v61 = vpop.permute.xlu0 %466 }
  0x94   : > { %4199 = vst [vmem:[#allocation130_spill] sm:$0xff] %v2959_v62  ;;  %791 = vperm.xlu1 %2053, %v2521_v11   ;;  %786 = vperm.xlu0 %2052, %v2524_v12   ;;  %v4202_v12 = vld [vmem:[#allocation73_spill] sm:$0xff] }
  0x97   : > { %v2965_v57 = vpop.permute.xlu1 %481  ;;  %v2967_v58 = vpop.permute.xlu0 %471 }
  0x98   : > { %4200 = vst [vmem:[#allocation131_spill] sm:$0xff] %v2965_v57  ;;  %801 = vperm.xlu1 %2053, %v2536_v10   ;;  %796 = vperm.xlu0 %2052, %v2539_v9  }
  0x9b   : > { %v2971_v0 = vpop.permute.xlu1 %491  ;;  %v2973_v63 = vpop.permute.xlu0 %486 }
  0x9c   : > { %811 = vperm.xlu1 %2053, %v2542_v8   ;;  %806 = vperm.xlu0 %2052, %v2554_v7   ;;  %v4205_v7 = vld [vmem:[#allocation76_spill] sm:$0xff] }
  0x9f   : > { %v2977_v62 = vpop.permute.xlu1 %501  ;;  %v2979_v11 = vpop.permute.xlu0 %496 }
  0xa0   : > { %4201 = vst [vmem:[#allocation132_spill] sm:$0xff] %v2979_v11  ;;  %821 = vperm.xlu1 %2053, %v2557_v6   ;;  %816 = vperm.xlu0 %2052, %v4202_v12   ;;  %v4206_v12 = vld [vmem:[#allocation78_spill] sm:$0xff] }
  0xa3   : > { %v2983_v57 = vpop.permute.xlu1 %511  ;;  %v2985_v10 = vpop.permute.xlu0 %506 }
  0xa4   : > { %4203 = vst [vmem:[#allocation133_spill] sm:$0xff] %v2983_v57  ;;  %4204 = vst [vmem:[#allocation134_spill] sm:$0xff] %v2985_v10  ;;  %831 = vperm.xlu1 %2053, %v2572_v3   ;;  %826 = vperm.xlu0 %2052, %v2575_v1   ;;  %v4207_v57 = vld [vmem:[#allocation79_spill] sm:$0xff] }
  0xa7   : > { %v2989_v9 = vpop.permute.xlu1 %521  ;;  %v2991_v8 = vpop.permute.xlu0 %516 }
  0xa8   : > { %841 = vperm.xlu1 %2053, %v4205_v7   ;;  %836 = vperm.xlu0 %2052, %v2592_v2  }
  0xab   : > { %v2995_v11 = vpop.permute.xlu1 %531  ;;  %v2997_v6 = vpop.permute.xlu0 %526 }
  0xac   : > { %851 = vperm.xlu1 %2053, %v4206_v12   ;;  %846 = vperm.xlu0 %2052, %v4207_v57  }
  0xaf   : > { %v3001_v10 = vpop.permute.xlu1 %541  ;;  %v3003_v3 = vpop.permute.xlu0 %536 }
  0xb0   : > { %861 = vperm.xlu1 %2053, %v2610_v14   ;;  %856 = vperm.xlu0 %2052, %v2613_v4  }
  0xb3   : > { %v3007_v1 = vpop.permute.xlu1 %551  ;;  %v3009_v7 = vpop.permute.xlu0 %546 }
  0xb4   : > { %871 = vperm.xlu1 %2053, %v2624_v5   ;;  %866 = vperm.xlu0 %2052, %v2627_v13  }
  0xb7   : > { %v3013_v2 = vpop.permute.xlu1 %561  ;;  %v3015_v12 = vpop.permute.xlu0 %556 }
  0xb8   : > { %881 = vperm.xlu1 %2053, %v2638_v16   ;;  %876 = vperm.xlu0 %2052, %v2641_v15  }
  0xbb   : > { %v3019_v57 = vpop.permute.xlu1 %571  ;;  %v3021_v14 = vpop.permute.xlu0 %566 }
  0xbc   : > { %891 = vperm.xlu1 %2053, %v2652_v18   ;;  %886 = vperm.xlu0 %2052, %v2655_v17  }
  0xbf   : > { %v3025_v4 = vpop.permute.xlu1 %581  ;;  %v3027_v5 = vpop.permute.xlu0 %576 }
  0xc0   : > { %901 = vperm.xlu1 %2053, %v2666_v20   ;;  %896 = vperm.xlu0 %2052, %v2669_v19  }
  0xc3   : > { %v3031_v13 = vpop.permute.xlu1 %591  ;;  %v3033_v16 = vpop.permute.xlu0 %586 }
  0xc4   : > { %911 = vperm.xlu1 %2053, %v2680_v22   ;;  %906 = vperm.xlu0 %2052, %v2683_v21  }
  0xc7   : > { %v3037_v15 = vpop.permute.xlu1 %601  ;;  %v3039_v18 = vpop.permute.xlu0 %596 }
  0xc8   : > { %921 = vperm.xlu1 %2053, %v2694_v24   ;;  %916 = vperm.xlu0 %2052, %v2697_v23  }
  0xcb   : > { %v3043_v17 = vpop.permute.xlu1 %611  ;;  %v3045_v20 = vpop.permute.xlu0 %606 }
  0xcc   : > { %931 = vperm.xlu1 %2053, %v2708_v26   ;;  %926 = vperm.xlu0 %2052, %v2711_v25  }
  0xcf   : > { %v3049_v19 = vpop.permute.xlu1 %621  ;;  %v3051_v22 = vpop.permute.xlu0 %616 }
  0xd0   : > { %941 = vperm.xlu1 %2053, %v2722_v28   ;;  %936 = vperm.xlu0 %2052, %v2725_v27  }
  0xd3   : > { %v3055_v21 = vpop.permute.xlu1 %631  ;;  %v3057_v24 = vpop.permute.xlu0 %626 }
  0xd4   : > { %951 = vperm.xlu1 %2053, %v2736_v30   ;;  %946 = vperm.xlu0 %2052, %v2739_v29  }
  0xd7   : > { %v3061_v23 = vpop.permute.xlu1 %641  ;;  %v3063_v26 = vpop.permute.xlu0 %636 }
  0xd8   : > { %961 = vperm.xlu1 %2053, %v2750_v32   ;;  %956 = vperm.xlu0 %2052, %v2753_v31  }
  0xdb   : > { %v3067_v25 = vpop.permute.xlu1 %651  ;;  %v3069_v28 = vpop.permute.xlu0 %646 }
  0xdc   : > { %971 = vperm.xlu1 %2053, %v2764_v34   ;;  %966 = vperm.xlu0 %2052, %v2767_v33  }
  0xdf   : > { %v3073_v27 = vpop.permute.xlu1 %661  ;;  %v3075_v30 = vpop.permute.xlu0 %656 }
  0xe0   : > { %981 = vperm.xlu1 %2053, %v2778_v36   ;;  %976 = vperm.xlu0 %2052, %v2781_v35  }
  0xe3   : > { %v3079_v29 = vpop.permute.xlu1 %671  ;;  %v3081_v32 = vpop.permute.xlu0 %666 }
  0xe4   : > { %991 = vperm.xlu1 %2053, %v2792_v38   ;;  %986 = vperm.xlu0 %2052, %v2795_v37  }
  0xe7   : > { %v3085_v31 = vpop.permute.xlu1 %681  ;;  %v3087_v34 = vpop.permute.xlu0 %676 }
  0xe8   : > { %1001 = vperm.xlu1 %2053, %v2806_v40   ;;  %996 = vperm.xlu0 %2052, %v2809_v39  }
  0xeb   : > { %v3091_v33 = vpop.permute.xlu1 %691  ;;  %v3093_v36 = vpop.permute.xlu0 %686 }
  0xec   : > { %1011 = vperm.xlu1 %2053, %v2820_v42   ;;  %1006 = vperm.xlu0 %2052, %v2823_v41  }
  0xef   : > { %v3097_v35 = vpop.permute.xlu1 %701  ;;  %v3099_v38 = vpop.permute.xlu0 %696 }
  0xf0   : > { %1021 = vperm.xlu1 %2053, %v2834_v44   ;;  %1016 = vperm.xlu0 %2052, %v2837_v43  }
  0xf3   : > { %v3103_v37 = vpop.permute.xlu1 %711  ;;  %v3105_v40 = vpop.permute.xlu0 %706 }
  0xf4   : > { %1031 = vperm.xlu1 %2053, %v2848_v46   ;;  %1026 = vperm.xlu0 %2052, %v2851_v45  }
  0xf7   : > { %v3109_v39 = vpop.permute.xlu1 %721  ;;  %v3111_v42 = vpop.permute.xlu0 %716 }
  0xf8   : > { %1041 = vperm.xlu1 %2053, %v2862_v48   ;;  %1036 = vperm.xlu0 %2052, %v2865_v47  }
  0xfb   : > { %v3115_v41 = vpop.permute.xlu1 %731  ;;  %v3117_v44 = vpop.permute.xlu0 %726 }
  0xfc   : > { %1051 = vperm.xlu1 %2053, %v2876_v50   ;;  %1046 = vperm.xlu0 %2052, %v2879_v49  }
  0xff   : > { %v3121_v43 = vpop.permute.xlu1 %741  ;;  %v3123_v46 = vpop.permute.xlu0 %736 }
 0x100   : > { %1061 = vperm.xlu1 %2053, %v2890_v52   ;;  %1056 = vperm.xlu0 %2052, %v2893_v51   ;;  %v4214_v51 = vld [vmem:[#allocation126_spill] sm:$0xff] }
 0x103   : > { %v3127_v45 = vpop.permute.xlu1 %751  ;;  %v3129_v48 = vpop.permute.xlu0 %746 }
 0x104   : > { %4208 = vst [vmem:[#allocation135_spill] sm:$0xff] %v3127_v45  ;;  %4209 = vst [vmem:[#allocation136_spill] sm:$0xff] %v3129_v48  ;;  %1071 = vperm.xlu1 %2053, %v2904_v54   ;;  %1066 = vperm.xlu0 %2052, %v2907_v53   ;;  %v4215_v45 = vld [vmem:[#allocation127_spill] sm:$0xff] }
 0x105   : > { %v4218_v53 = vld [vmem:[#allocation3_spill] sm:$0xff] }
 0x107   : > { %v3133_v47 = vpop.permute.xlu1 %761  ;;  %v3135_v50 = vpop.permute.xlu0 %756 }
 0x108   : > { %4210 = vst [vmem:[#allocation137_spill] sm:$0xff] %v3133_v47  ;;  %4211 = vst [vmem:[#allocation138_spill] sm:$0xff] %v3135_v50  ;;  %1081 = vperm.xlu1 %2053, %v2918_v56   ;;  %1076 = vperm.xlu0 %2052, %v2921_v55   ;;  %v1104_v56 = vmul.f32 %v2961_v61, %v4218_v53  ;;  %v4219_v55 = vld [vmem:[#allocation5_spill] sm:$0xff] }
 0x10b   : > { %v3139_v49 = vpop.permute.xlu1 %771  ;;  %v3141_v52 = vpop.permute.xlu0 %766 }
 0x10c   : > { %4212 = vst [vmem:[#allocation139_spill] sm:$0xff] %v3139_v49  ;;  %4213 = vst [vmem:[#allocation140_spill] sm:$0xff] %v3141_v52  ;;  %1091 = vperm.xlu1 %2053, %v4214_v51   ;;  %1086 = vperm.xlu0 %2052, %v4215_v45   ;;  %v1105_v49 = vmul.f32 %v2967_v58, %v4219_v55  ;;  %v4220_v45 = vld [vmem:[#allocation2_spill] sm:$0xff] }
 0x10d   : > { %v4221_v51 = vld [vmem:[#allocation130_spill] sm:$0xff] }
 0x10e   : > { %v4225_v55 = vld [vmem:[#allocation6_spill] sm:$0xff] }
 0x10f   : > { %v3145_v48 = vpop.permute.xlu1 %781  ;;  %v3147_v54 = vpop.permute.xlu0 %776  ;;  %v1109_v58 = vmul.f32 %v2971_v0, %v4225_v55  ;;  %v4233_v55 = vld [vmem:[#allocation133_spill] sm:$0xff] }
 0x110   : > { %4216 = vst [vmem:[#allocation141_spill] sm:$0xff] %v3145_v48  ;;  %4217 = vst [vmem:[#allocation142_spill] sm:$0xff] %v3147_v54  ;;  %1101 = vperm.xlu1 %2053, %v2946_v60   ;;  %1096 = vperm.xlu0 %2052, %v2949_v59   ;;  %v1106_v60 = vmul.f32 %v4221_v51, %v4220_v45  ;;  %v4222_v54 = vld [vmem:[#allocation4_spill] sm:$0xff]  ;;  %v4223_v59 = vld [vmem:[#allocation131_spill] sm:$0xff] }
 0x111   : > { %v1107_v48 = vmul.f32 %v4223_v59, %v4222_v54  ;;  %v4229_v51 = vld [vmem:[#allocation8_spill] sm:$0xff] }
 0x112   : > { %v1111_v54 = vmul.f32 %v2977_v62, %v4229_v51  ;;  %v4231_v59 = vld [vmem:[#allocation132_spill] sm:$0xff] }
 0x113   : > { %v3155_v50 = vpop.permute.xlu1 %791  ;;  %v3157_v52 = vpop.permute.xlu0 %786  ;;  %v4236_v51 = vld [vmem:[#allocation12_spill] sm:$0xff] }
 0x114   : > { %1362 = vrot.lane.b32.xlu1 %v1105_v49, %s2079_s20  ;;  %1360 = vrot.lane.b32.xlu0 %v1104_v56, %s2079_s20  ;;  %v4226_v49 = vld [vmem:[#allocation7_spill] sm:$0xff] }
 0x115   : > { %v1108_v56 = vmul.f32 %v2973_v63, %v4226_v49  ;;  %v4232_v63 = vld [vmem:[#allocation10_spill] sm:$0xff] }
 0x116   : > { %v1113_v49 = vmul.f32 %v4233_v55, %v4232_v63 }
 0x117   : > { %v3165_v47 = vpop.permute.xlu1 %801  ;;  %v3167_v53 = vpop.permute.xlu0 %796 }
 0x118   : > { %4224 = vst [vmem:[#allocation3_spill] sm:$0xff] %v3167_v53  ;;  %1366 = vrot.lane.b32.xlu1 %v1107_v48, %s2079_s20  ;;  %1364 = vrot.lane.b32.xlu0 %v1106_v60, %s2079_s20  ;;  %v4230_v48 = vld [vmem:[#allocation9_spill] sm:$0xff] }
 0x119   : > { %v1110_v60 = vmul.f32 %v4231_v59, %v4230_v48  ;;  %v1115_v48 = vmul.f32 %v2989_v9, %v4236_v51 }
 0x11b   : > { %v3175_v61 = vpop.permute.xlu1 %811  ;;  %v3177_v45 = vpop.permute.xlu0 %806 }
 0x11c   : > { %4227 = vst [vmem:[#allocation5_spill] sm:$0xff] %v3175_v61  ;;  %4228 = vst [vmem:[#allocation2_spill] sm:$0xff] %v3177_v45  ;;  %1370 = vrot.lane.b32.xlu1 %v1109_v58, %s2079_s20  ;;  %1368 = vrot.lane.b32.xlu0 %v1108_v56, %s2079_s20  ;;  %v4234_v58 = vld [vmem:[#allocation11_spill] sm:$0xff]  ;;  %v4235_v45 = vld [vmem:[#allocation134_spill] sm:$0xff] }
 0x11d   : > { %v1112_v56 = vmul.f32 %v4235_v45, %v4234_v58  ;;  %v4238_v45 = vld [vmem:[#allocation14_spill] sm:$0xff] }
 0x11e   : > { %v1117_v55 = vmul.f32 %v2995_v11, %v4238_v45 }
 0x11f   : > { %v3185_v53 = vpop.permute.xlu1 %821  ;;  %v3187_v0 = vpop.permute.xlu0 %816 }
 0x120   : > { %1374 = vrot.lane.b32.xlu1 %v1111_v54, %s2079_s20  ;;  %1372 = vrot.lane.b32.xlu0 %v1110_v60, %s2079_s20  ;;  %v4237_v54 = vld [vmem:[#allocation13_spill] sm:$0xff] }
 0x121   : > { %v1114_v59 = vmul.f32 %v2991_v8, %v4237_v54  ;;  %v4240_v8 = vld [vmem:[#allocation16_spill] sm:$0xff] }
 0x122   : > { %v1119_v51 = vmul.f32 %v3001_v10, %v4240_v8 }
 0x123   : > { %v3195_v61 = vpop.permute.xlu1 %831  ;;  %v3197_v62 = vpop.permute.xlu0 %826 }
 0x124   : > { %1378 = vrot.lane.b32.xlu1 %v1113_v49, %s2079_s20  ;;  %1376 = vrot.lane.b32.xlu0 %v1112_v56, %s2079_s20  ;;  %v4239_v49 = vld [vmem:[#allocation15_spill] sm:$0xff] }
 0x125   : > { %v1116_v58 = vmul.f32 %v2997_v6, %v4239_v49  ;;  %v4242_v6 = vld [vmem:[#allocation18_spill] sm:$0xff] }
 0x126   : > { %v1121_v45 = vmul.f32 %v3007_v1, %v4242_v6 }
 0x127   : > { %v3205_v60 = vpop.permute.xlu1 %841  ;;  %v3207_v63 = vpop.permute.xlu0 %836 }
 0x128   : > { %1382 = vrot.lane.b32.xlu1 %v1115_v48, %s2079_s20  ;;  %1380 = vrot.lane.b32.xlu0 %v1114_v59, %s2079_s20  ;;  %v4241_v48 = vld [vmem:[#allocation17_spill] sm:$0xff] }
 0x129   : > { %v1118_v54 = vmul.f32 %v3003_v3, %v4241_v48  ;;  %v4244_v3 = vld [vmem:[#allocation20_spill] sm:$0xff] }
 0x12a   : > { %v1123_v8 = vmul.f32 %v3013_v2, %v4244_v3 }
 0x12b   : > { %v3215_v56 = vpop.permute.xlu1 %851  ;;  %v3217_v9 = vpop.permute.xlu0 %846 }
 0x12c   : > { %1386 = vrot.lane.b32.xlu1 %v1117_v55, %s2079_s20  ;;  %1384 = vrot.lane.b32.xlu0 %v1116_v58, %s2079_s20  ;;  %v4243_v55 = vld [vmem:[#allocation19_spill] sm:$0xff] }
 0x12d   : > { %v1120_v49 = vmul.f32 %v3009_v7, %v4243_v55  ;;  %v4246_v7 = vld [vmem:[#allocation22_spill] sm:$0xff] }
 0x12e   : > { %v1125_v6 = vmul.f32 %v3019_v57, %v4246_v7 }
 0x12f   : > { %v3225_v59 = vpop.permute.xlu1 %861  ;;  %v3227_v11 = vpop.permute.xlu0 %856 }
 0x130   : > { %1390 = vrot.lane.b32.xlu1 %v1119_v51, %s2079_s20  ;;  %1388 = vrot.lane.b32.xlu0 %v1118_v54, %s2079_s20  ;;  %v4245_v51 = vld [vmem:[#allocation21_spill] sm:$0xff] }
 0x131   : > { %v1122_v48 = vmul.f32 %v3015_v12, %v4245_v51  ;;  %v4248_v12 = vld [vmem:[#allocation24_spill] sm:$0xff] }
 0x132   : > { %v1127_v3 = vmul.f32 %v3025_v4, %v4248_v12 }
 0x133   : > { %v3235_v58 = vpop.permute.xlu1 %871  ;;  %v3237_v10 = vpop.permute.xlu0 %866 }
 0x134   : > { %1394 = vrot.lane.b32.xlu1 %v1121_v45, %s2079_s20  ;;  %1392 = vrot.lane.b32.xlu0 %v1120_v49, %s2079_s20  ;;  %v4247_v45 = vld [vmem:[#allocation23_spill] sm:$0xff] }
 0x135   : > { %v1124_v55 = vmul.f32 %v3021_v14, %v4247_v45  ;;  %v4250_v14 = vld [vmem:[#allocation26_spill] sm:$0xff] }
 0x136   : > { %v1129_v7 = vmul.f32 %v3031_v13, %v4250_v14 }
 0x137   : > { %v3245_v54 = vpop.permute.xlu1 %881  ;;  %v3247_v1 = vpop.permute.xlu0 %876 }
 0x138   : > { %1398 = vrot.lane.b32.xlu1 %v1123_v8, %s2079_s20  ;;  %1396 = vrot.lane.b32.xlu0 %v1122_v48, %s2079_s20  ;;  %v4249_v8 = vld [vmem:[#allocation25_spill] sm:$0xff] }
 0x139   : > { %v1126_v51 = vmul.f32 %v3027_v5, %v4249_v8  ;;  %v4252_v5 = vld [vmem:[#allocation28_spill] sm:$0xff] }
 0x13a   : > { %v1131_v12 = vmul.f32 %v3037_v15, %v4252_v5 }
 0x13b   : > { %v3255_v49 = vpop.permute.xlu1 %891  ;;  %v3257_v2 = vpop.permute.xlu0 %886 }
 0x13c   : > { %1402 = vrot.lane.b32.xlu1 %v1125_v6, %s2079_s20  ;;  %1400 = vrot.lane.b32.xlu0 %v1124_v55, %s2079_s20  ;;  %v4251_v6 = vld [vmem:[#allocation27_spill] sm:$0xff] }
 0x13d   : > { %v1128_v45 = vmul.f32 %v3033_v16, %v4251_v6  ;;  %v4254_v16 = vld [vmem:[#allocation30_spill] sm:$0xff] }
 0x13e   : > { %v1133_v14 = vmul.f32 %v3043_v17, %v4254_v16 }
 0x13f   : > { %v3265_v48 = vpop.permute.xlu1 %901  ;;  %v3267_v57 = vpop.permute.xlu0 %896 }
 0x140   : > { %1406 = vrot.lane.b32.xlu1 %v1127_v3, %s2079_s20  ;;  %1404 = vrot.lane.b32.xlu0 %v1126_v51, %s2079_s20  ;;  %v4253_v3 = vld [vmem:[#allocation29_spill] sm:$0xff] }
 0x141   : > { %v1130_v8 = vmul.f32 %v3039_v18, %v4253_v3  ;;  %v4256_v18 = vld [vmem:[#allocation32_spill] sm:$0xff] }
 0x142   : > { %v1135_v5 = vmul.f32 %v3049_v19, %v4256_v18 }
 0x143   : > { %v3275_v55 = vpop.permute.xlu1 %911  ;;  %v3277_v4 = vpop.permute.xlu0 %906 }
 0x144   : > { %1410 = vrot.lane.b32.xlu1 %v1129_v7, %s2079_s20  ;;  %1408 = vrot.lane.b32.xlu0 %v1128_v45, %s2079_s20  ;;  %v4255_v7 = vld [vmem:[#allocation31_spill] sm:$0xff] }
 0x145   : > { %v1132_v6 = vmul.f32 %v3045_v20, %v4255_v7  ;;  %v4258_v20 = vld [vmem:[#allocation34_spill] sm:$0xff] }
 0x146   : > { %v1137_v16 = vmul.f32 %v3055_v21, %v4258_v20 }
 0x147   : > { %v3285_v51 = vpop.permute.xlu1 %921  ;;  %v3287_v13 = vpop.permute.xlu0 %916 }
 0x148   : > { %1414 = vrot.lane.b32.xlu1 %v1131_v12, %s2079_s20  ;;  %1412 = vrot.lane.b32.xlu0 %v1130_v8, %s2079_s20  ;;  %v4257_v12 = vld [vmem:[#allocation33_spill] sm:$0xff] }
 0x149   : > { %v1134_v3 = vmul.f32 %v3051_v22, %v4257_v12  ;;  %v4260_v22 = vld [vmem:[#allocation36_spill] sm:$0xff] }
 0x14a   : > { %v1139_v18 = vmul.f32 %v3061_v23, %v4260_v22 }
 0x14b   : > { %v3295_v45 = vpop.permute.xlu1 %931  ;;  %v3297_v15 = vpop.permute.xlu0 %926 }
 0x14c   : > { %1418 = vrot.lane.b32.xlu1 %v1133_v14, %s2079_s20  ;;  %1416 = vrot.lane.b32.xlu0 %v1132_v6, %s2079_s20  ;;  %v4259_v14 = vld [vmem:[#allocation35_spill] sm:$0xff] }
 0x14d   : > { %v1136_v7 = vmul.f32 %v3057_v24, %v4259_v14  ;;  %v4262_v24 = vld [vmem:[#allocation38_spill] sm:$0xff] }
 0x14e   : > { %v1141_v20 = vmul.f32 %v3067_v25, %v4262_v24 }
 0x14f   : > { %v3305_v8 = vpop.permute.xlu1 %941  ;;  %v3307_v17 = vpop.permute.xlu0 %936 }
 0x150   : > { %1422 = vrot.lane.b32.xlu1 %v1135_v5, %s2079_s20  ;;  %1420 = vrot.lane.b32.xlu0 %v1134_v3, %s2079_s20  ;;  %v4261_v5 = vld [vmem:[#allocation37_spill] sm:$0xff] }
 0x151   : > { %v1138_v12 = vmul.f32 %v3063_v26, %v4261_v5  ;;  %v4264_v26 = vld [vmem:[#allocation40_spill] sm:$0xff] }
 0x152   : > { %v1143_v22 = vmul.f32 %v3073_v27, %v4264_v26 }
 0x153   : > { %v3315_v6 = vpop.permute.xlu1 %951  ;;  %v3317_v19 = vpop.permute.xlu0 %946 }
 0x154   : > { %1426 = vrot.lane.b32.xlu1 %v1137_v16, %s2079_s20  ;;  %1424 = vrot.lane.b32.xlu0 %v1136_v7, %s2079_s20  ;;  %v4263_v16 = vld [vmem:[#allocation39_spill] sm:$0xff] }
 0x155   : > { %v1140_v14 = vmul.f32 %v3069_v28, %v4263_v16  ;;  %v4266_v28 = vld [vmem:[#allocation42_spill] sm:$0xff] }
 0x156   : > { %v1145_v24 = vmul.f32 %v3079_v29, %v4266_v28 }
 0x157   : > { %v3325_v3 = vpop.permute.xlu1 %961  ;;  %v3327_v21 = vpop.permute.xlu0 %956 }
 0x158   : > { %1430 = vrot.lane.b32.xlu1 %v1139_v18, %s2079_s20  ;;  %1428 = vrot.lane.b32.xlu0 %v1138_v12, %s2079_s20  ;;  %v4265_v18 = vld [vmem:[#allocation41_spill] sm:$0xff] }
 0x159   : > { %v1142_v5 = vmul.f32 %v3075_v30, %v4265_v18  ;;  %v4268_v30 = vld [vmem:[#allocation44_spill] sm:$0xff] }
 0x15a   : > { %v1147_v26 = vmul.f32 %v3085_v31, %v4268_v30 }
 0x15b   : > { %v3335_v7 = vpop.permute.xlu1 %971  ;;  %v3337_v23 = vpop.permute.xlu0 %966 }
 0x15c   : > { %1434 = vrot.lane.b32.xlu1 %v1141_v20, %s2079_s20  ;;  %1432 = vrot.lane.b32.xlu0 %v1140_v14, %s2079_s20  ;;  %v4267_v20 = vld [vmem:[#allocation43_spill] sm:$0xff] }
 0x15d   : > { %v1144_v16 = vmul.f32 %v3081_v32, %v4267_v20  ;;  %v4270_v32 = vld [vmem:[#allocation46_spill] sm:$0xff] }
 0x15e   : > { %v1149_v28 = vmul.f32 %v3091_v33, %v4270_v32 }
 0x15f   : > { %v3345_v12 = vpop.permute.xlu1 %981  ;;  %v3347_v25 = vpop.permute.xlu0 %976 }
 0x160   : > { %1438 = vrot.lane.b32.xlu1 %v1143_v22, %s2079_s20  ;;  %1436 = vrot.lane.b32.xlu0 %v1142_v5, %s2079_s20  ;;  %v4269_v22 = vld [vmem:[#allocation45_spill] sm:$0xff] }
 0x161   : > { %v1146_v18 = vmul.f32 %v3087_v34, %v4269_v22  ;;  %v4272_v34 = vld [vmem:[#allocation48_spill] sm:$0xff] }
 0x162   : > { %v1151_v30 = vmul.f32 %v3097_v35, %v4272_v34 }
 0x163   : > { %v3355_v14 = vpop.permute.xlu1 %991  ;;  %v3357_v27 = vpop.permute.xlu0 %986 }
 0x164   : > { %1442 = vrot.lane.b32.xlu1 %v1145_v24, %s2079_s20  ;;  %1440 = vrot.lane.b32.xlu0 %v1144_v16, %s2079_s20  ;;  %v4271_v24 = vld [vmem:[#allocation47_spill] sm:$0xff] }
 0x165   : > { %v1148_v20 = vmul.f32 %v3093_v36, %v4271_v24  ;;  %v4274_v36 = vld [vmem:[#allocation50_spill] sm:$0xff] }
 0x166   : > { %v1153_v32 = vmul.f32 %v3103_v37, %v4274_v36 }
 0x167   : > { %v3365_v5 = vpop.permute.xlu1 %1001  ;;  %v3367_v29 = vpop.permute.xlu0 %996 }
 0x168   : > { %1446 = vrot.lane.b32.xlu1 %v1147_v26, %s2079_s20  ;;  %1444 = vrot.lane.b32.xlu0 %v1146_v18, %s2079_s20  ;;  %v4273_v26 = vld [vmem:[#allocation49_spill] sm:$0xff] }
 0x169   : > { %v1150_v22 = vmul.f32 %v3099_v38, %v4273_v26  ;;  %v4276_v38 = vld [vmem:[#allocation52_spill] sm:$0xff] }
 0x16a   : > { %v1155_v34 = vmul.f32 %v3109_v39, %v4276_v38 }
 0x16b   : > { %v3375_v16 = vpop.permute.xlu1 %1011  ;;  %v3377_v31 = vpop.permute.xlu0 %1006 }
 0x16c   : > { %1450 = vrot.lane.b32.xlu1 %v1149_v28, %s2079_s20  ;;  %1448 = vrot.lane.b32.xlu0 %v1148_v20, %s2079_s20  ;;  %v4275_v28 = vld [vmem:[#allocation51_spill] sm:$0xff] }
 0x16d   : > { %v1152_v24 = vmul.f32 %v3105_v40, %v4275_v28  ;;  %v4278_v40 = vld [vmem:[#allocation54_spill] sm:$0xff] }
 0x16e   : > { %v1157_v36 = vmul.f32 %v3115_v41, %v4278_v40  ;;  %v4287_v40 = vld [vmem:[#allocation135_spill] sm:$0xff] }
 0x16f   : > { %v3385_v18 = vpop.permute.xlu1 %1021  ;;  %v3387_v33 = vpop.permute.xlu0 %1016 }
 0x170   : > { %1454 = vrot.lane.b32.xlu1 %v1151_v30, %s2079_s20  ;;  %1452 = vrot.lane.b32.xlu0 %v1150_v22, %s2079_s20  ;;  %v4277_v30 = vld [vmem:[#allocation53_spill] sm:$0xff] }
 0x171   : > { %v1154_v26 = vmul.f32 %v3111_v42, %v4277_v30  ;;  %v4282_v42 = vld [vmem:[#allocation56_spill] sm:$0xff] }
 0x172   : > { %v1159_v38 = vmul.f32 %v3121_v43, %v4282_v42  ;;  %v4293_v42 = vld [vmem:[#allocation137_spill] sm:$0xff] }
 0x173   : > { %v3395_v20 = vpop.permute.xlu1 %1031  ;;  %v3397_v35 = vpop.permute.xlu0 %1026 }
 0x174   : > { %1458 = vrot.lane.b32.xlu1 %v1153_v32, %s2079_s20  ;;  %1456 = vrot.lane.b32.xlu0 %v1152_v24, %s2079_s20  ;;  %v4279_v32 = vld [vmem:[#allocation55_spill] sm:$0xff] }
 0x175   : > { %v1156_v28 = vmul.f32 %v3117_v44, %v4279_v32  ;;  %v4286_v44 = vld [vmem:[#allocation58_spill] sm:$0xff] }
 0x176   : > { %v1161_v32 = vmul.f32 %v4287_v40, %v4286_v44  ;;  %v4299_v40 = vld [vmem:[#allocation139_spill] sm:$0xff] }
 0x177   : > { %v3405_v22 = vpop.permute.xlu1 %1041  ;;  %v3407_v37 = vpop.permute.xlu0 %1036 }
 0x178   : > { %1462 = vrot.lane.b32.xlu1 %v1155_v34, %s2079_s20  ;;  %1460 = vrot.lane.b32.xlu0 %v1154_v26, %s2079_s20  ;;  %v4283_v34 = vld [vmem:[#allocation57_spill] sm:$0xff] }
 0x179   : > { %v1158_v30 = vmul.f32 %v3123_v46, %v4283_v34  ;;  %v4292_v46 = vld [vmem:[#allocation60_spill] sm:$0xff] }
 0x17a   : > { %v1163_v34 = vmul.f32 %v4293_v42, %v4292_v46  ;;  %v4303_v42 = vld [vmem:[#allocation141_spill] sm:$0xff] }
 0x17b   : > { %v3415_v24 = vpop.permute.xlu1 %1051  ;;  %v3417_v39 = vpop.permute.xlu0 %1046 }
 0x17c   : > { %4280 = vst [vmem:[#allocation130_spill] sm:$0xff] %v3415_v24  ;;  %4281 = vst [vmem:[#allocation4_spill] sm:$0xff] %v3417_v39  ;;  %1466 = vrot.lane.b32.xlu1 %v1157_v36, %s2079_s20  ;;  %1464 = vrot.lane.b32.xlu0 %v1156_v28, %s2079_s20  ;;  %v4288_v36 = vld [vmem:[#allocation59_spill] sm:$0xff]  ;;  %v4289_v39 = vld [vmem:[#allocation136_spill] sm:$0xff] }
 0x17d   : > { %v1160_v28 = vmul.f32 %v4289_v39, %v4288_v36  ;;  %v4298_v39 = vld [vmem:[#allocation62_spill] sm:$0xff]  ;;  %v4300_v36 = vld [vmem:[#allocation63_spill] sm:$0xff] }
 0x17f   : > { %v3425_v26 = vpop.permute.xlu1 %1061  ;;  %v3427_v41 = vpop.permute.xlu0 %1056 }
 0x180   : > { %4284 = vst [vmem:[#allocation131_spill] sm:$0xff] %v3425_v26  ;;  %4285 = vst [vmem:[#allocation6_spill] sm:$0xff] %v3427_v41  ;;  %1470 = vrot.lane.b32.xlu1 %v1159_v38, %s2079_s20  ;;  %1468 = vrot.lane.b32.xlu0 %v1158_v30, %s2079_s20  ;;  %v4294_v38 = vld [vmem:[#allocation61_spill] sm:$0xff]  ;;  %v4295_v41 = vld [vmem:[#allocation138_spill] sm:$0xff] }
 0x181   : > { %v1162_v30 = vmul.f32 %v4295_v41, %v4294_v38  ;;  %v4302_v41 = vld [vmem:[#allocation64_spill] sm:$0xff] }
 0x182   : > { %v1167_v38 = vmul.f32 %v4303_v42, %v4302_v41  ;;  %v4308_v41 = vld [vmem:[#allocation68_spill] sm:$0xff] }
 0x183   : > { %v3435_v24 = vpop.permute.xlu1 %1071  ;;  %v3437_v43 = vpop.permute.xlu0 %1066  ;;  %v1171_v42 = vmul.f32 %v3165_v47, %v4308_v41  ;;  %v4314_v47 = vld [vmem:[#allocation2_spill] sm:$0xff] }
 0x184   : > { %4290 = vst [vmem:[#allocation7_spill] sm:$0xff] %v3435_v24  ;;  %4291 = vst [vmem:[#allocation8_spill] sm:$0xff] %v3437_v43  ;;  %1474 = vrot.lane.b32.xlu1 %v1161_v32, %s2079_s20  ;;  %1472 = vrot.lane.b32.xlu0 %v1160_v28, %s2079_s20  ;;  %v1165_v32 = vmul.f32 %v4299_v40, %v4298_v39  ;;  %v4301_v28 = vld [vmem:[#allocation140_spill] sm:$0xff]  ;;  %v4307_v40 = vld [vmem:[#allocation67_spill] sm:$0xff] }
 0x185   : > { %v1164_v43 = vmul.f32 %v4301_v28, %v4300_v36 }
 0x187   : > { %v3445_v26 = vpop.permute.xlu1 %1081  ;;  %v3447_v44 = vpop.permute.xlu0 %1076 }
 0x188   : > { %4296 = vst [vmem:[#allocation9_spill] sm:$0xff] %v3445_v26  ;;  %4297 = vst [vmem:[#allocation132_spill] sm:$0xff] %v3447_v44  ;;  %1478 = vrot.lane.b32.xlu1 %v1163_v34, %s2079_s20  ;;  %1476 = vrot.lane.b32.xlu0 %v1162_v30, %s2079_s20  ;;  %v4304_v34 = vld [vmem:[#allocation65_spill] sm:$0xff]  ;;  %v4305_v44 = vld [vmem:[#allocation142_spill] sm:$0xff] }
 0x189   : > { %v1166_v30 = vmul.f32 %v4305_v44, %v4304_v34 }
 0x18b   : > { %v3455_v24 = vpop.permute.xlu1 %1091  ;;  %v3457_v46 = vpop.permute.xlu0 %1086 }
 0x18c   : > { %1482 = vrot.lane.b32.xlu1 %v1165_v32, %s2079_s20  ;;  %1480 = vrot.lane.b32.xlu0 %v1164_v43, %s2079_s20  ;;  %v4306_v43 = vld [vmem:[#allocation66_spill] sm:$0xff]  ;;  %v1168_v32 = vmul.f32 %v3157_v52, %v4307_v40 }
 0x18d   : > { %v1169_v44 = vmul.f32 %v3155_v50, %v4306_v43  ;;  %v4310_v50 = vld [vmem:[#allocation3_spill] sm:$0xff]  ;;  %v4311_v43 = vld [vmem:[#allocation70_spill] sm:$0xff] }
 0x18f   : > { %v3465_v26 = vpop.permute.xlu1 %1101  ;;  %v3467_v39 = vpop.permute.xlu0 %1096 }
 0x190   : > { %1486 = vrot.lane.b32.xlu1 %v1167_v38, %s2079_s20  ;;  %1484 = vrot.lane.b32.xlu0 %v1166_v30, %s2079_s20  ;;  %v4309_v38 = vld [vmem:[#allocation69_spill] sm:$0xff] }
 0x191   : > { %v1170_v34 = vmul.f32 %v4310_v50, %v4309_v38  ;;  %v4316_v50 = vld [vmem:[#allocation73_spill] sm:$0xff] }
 0x193   : > { %v1363_v36 = vpop.permute.xlu1 %1362  ;;  %v1361_v28 = vpop.permute.xlu0 %1360 }
 0x194   : > { %1746 = vst.msk [vmem:[%s3475_s23 + $0x8] sm:$0xff] %vm1744_vm1, %v1363_v36  ;;  %1745 = vst.msk [vmem:[%s3475_s23] sm:$0xff] %vm1744_vm1, %v1361_v28  ;;  %1490 = vrot.lane.b32.xlu1 %v1169_v44, %s2079_s20  ;;  %1488 = vrot.lane.b32.xlu0 %v1168_v32, %s2079_s20  ;;  %v4312_v44 = vld [vmem:[#allocation5_spill] sm:$0xff]  ;;  %v4313_v32 = vld [vmem:[#allocation71_spill] sm:$0xff] }
 0x195   : > { %v1173_v40 = vmul.f32 %v4312_v44, %v4311_v43  ;;  %v1172_v36 = vmul.f32 %v4314_v47, %v4313_v32  ;;  %v4317_v43 = vld [vmem:[#allocation74_spill] sm:$0xff]  ;;  %v4319_v47 = vld [vmem:[#allocation76_spill] sm:$0xff] }
 0x196   : > { %v1177_v44 = vmul.f32 %v3195_v61, %v4317_v43  ;;  %v4324_v43 = vld [vmem:[#allocation81_spill] sm:$0xff] }
 0x197   : > { %v1367_v30 = vpop.permute.xlu1 %1366  ;;  %v1365_v52 = vpop.permute.xlu0 %1364 }
 0x198   : > { %1748 = vst.msk [vmem:[%s3475_s23 + $0x18] sm:$0xff] %vm1744_vm1, %v1367_v30  ;;  %1747 = vst.msk [vmem:[%s3475_s23 + $0x10] sm:$0xff] %vm1744_vm1, %v1365_v52  ;;  %1494 = vrot.lane.b32.xlu1 %v1171_v42, %s2079_s20  ;;  %1492 = vrot.lane.b32.xlu0 %v1170_v34, %s2079_s20  ;;  %v4315_v42 = vld [vmem:[#allocation72_spill] sm:$0xff]  ;;  %v1174_v34 = vmul.f32 %v3187_v0, %v4316_v50  ;;  %v4322_v50 = vld [vmem:[#allocation79_spill] sm:$0xff] }
 0x199   : > { %v1175_v38 = vmul.f32 %v3185_v53, %v4315_v42  ;;  %v4321_v42 = vld [vmem:[#allocation78_spill] sm:$0xff] }
 0x19b   : > { %v1371_v28 = vpop.permute.xlu1 %1370  ;;  %v1369_v41 = vpop.permute.xlu0 %1368 }
 0x19c   : > { %1750 = vst.msk [vmem:[%s3475_s23 + $0x28] sm:$0xff] %vm1744_vm1, %v1371_v28  ;;  %1749 = vst.msk [vmem:[%s3475_s23 + $0x20] sm:$0xff] %vm1744_vm1, %v1369_v41  ;;  %1498 = vrot.lane.b32.xlu1 %v1173_v40, %s2079_s20  ;;  %1496 = vrot.lane.b32.xlu0 %v1172_v36, %s2079_s20  ;;  %v4318_v40 = vld [vmem:[#allocation75_spill] sm:$0xff]  ;;  %v1179_v36 = vmul.f32 %v3205_v60, %v4319_v47  ;;  %v4320_v28 = vld [vmem:[#allocation77_spill] sm:$0xff]  ;;  %v1180_v60 = vmul.f32 %v3217_v9, %v4322_v50 }
 0x19d   : > { %v1176_v53 = vmul.f32 %v3197_v62, %v4318_v40  ;;  %v1178_v61 = vmul.f32 %v3207_v63, %v4320_v28  ;;  %v4325_v40 = vld [vmem:[#allocation82_spill] sm:$0xff]  ;;  %v4327_v47 = vld [vmem:[#allocation84_spill] sm:$0xff]  ;;  %v4328_v28 = vld [vmem:[#allocation85_spill] sm:$0xff] }
 0x19e   : > { %v4331_v50 = vld [vmem:[#allocation88_spill] sm:$0xff] }
 0x19f   : > { %v1375_v30 = vpop.permute.xlu1 %1374  ;;  %v1373_v52 = vpop.permute.xlu0 %1372 }
 0x1a0   : > { %1752 = vst.msk [vmem:[%s3475_s23 + $0x38] sm:$0xff] %vm1744_vm1, %v1375_v30  ;;  %1751 = vst.msk [vmem:[%s3475_s23 + $0x30] sm:$0xff] %vm1744_vm1, %v1373_v52  ;;  %1502 = vrot.lane.b32.xlu1 %v1175_v38, %s2079_s20  ;;  %1500 = vrot.lane.b32.xlu0 %v1174_v34, %s2079_s20  ;;  %v1181_v38 = vmul.f32 %v3215_v56, %v4321_v42  ;;  %v4323_v30 = vld [vmem:[#allocation80_spill] sm:$0xff]  ;;  %v1182_v56 = vmul.f32 %v3227_v11, %v4324_v43  ;;  %v4330_v42 = vld [vmem:[#allocation87_spill] sm:$0xff] }
 0x1a1   : > { %v1183_v52 = vmul.f32 %v3225_v59, %v4323_v30  ;;  %v4333_v30 = vld [vmem:[#allocation90_spill] sm:$0xff]  ;;  %v4334_v43 = vld [vmem:[#allocation91_spill] sm:$0xff] }
 0x1a3   : > { %v1379_v32 = vpop.permute.xlu1 %1378  ;;  %v1377_v0 = vpop.permute.xlu0 %1376 }
 0x1a4   : > { %1754 = vst.msk [vmem:[%s3475_s23 + $0x48] sm:$0xff] %vm1744_vm1, %v1379_v32  ;;  %1753 = vst.msk [vmem:[%s3475_s23 + $0x40] sm:$0xff] %vm1744_vm1, %v1377_v0  ;;  %1506 = vrot.lane.b32.xlu1 %v1177_v44, %s2079_s20  ;;  %1504 = vrot.lane.b32.xlu0 %v1176_v53, %s2079_s20  ;;  %v1185_v53 = vmul.f32 %v3235_v58, %v4325_v40  ;;  %v4326_v32 = vld [vmem:[#allocation83_spill] sm:$0xff]  ;;  %v1186_v58 = vmul.f32 %v3247_v1, %v4328_v28  ;;  %v4336_v40 = vld [vmem:[#allocation93_spill] sm:$0xff] }
 0x1a5   : > { %v1184_v59 = vmul.f32 %v3237_v10, %v4326_v32  ;;  %v4337_v32 = vld [vmem:[#allocation94_spill] sm:$0xff]  ;;  %v4340_v28 = vld [vmem:[#allocation97_spill] sm:$0xff] }
 0x1a7   : > { %v1383_v41 = vpop.permute.xlu1 %1382  ;;  %v1381_v62 = vpop.permute.xlu0 %1380 }
 0x1a8   : > { %1756 = vst.msk [vmem:[%s3475_s23 + $0x58] sm:$0xff] %vm1744_vm1, %v1383_v41  ;;  %1755 = vst.msk [vmem:[%s3475_s23 + $0x50] sm:$0xff] %vm1744_vm1, %v1381_v62  ;;  %1510 = vrot.lane.b32.xlu1 %v1179_v36, %s2079_s20  ;;  %1508 = vrot.lane.b32.xlu0 %v1178_v61, %s2079_s20  ;;  %v1187_v36 = vmul.f32 %v3245_v54, %v4327_v47  ;;  %v4329_v41 = vld [vmem:[#allocation86_spill] sm:$0xff]  ;;  %v1188_v54 = vmul.f32 %v3257_v2, %v4330_v42  ;;  %v4339_v47 = vld [vmem:[#allocation96_spill] sm:$0xff] }
 0x1a9   : > { %v1189_v62 = vmul.f32 %v3255_v49, %v4329_v41  ;;  %v4342_v41 = vld [vmem:[#allocation99_spill] sm:$0xff]  ;;  %v4343_v42 = vld [vmem:[#allocation100_spill] sm:$0xff] }
 0x1ab   : > { %v1387_v34 = vpop.permute.xlu1 %1386  ;;  %v1385_v63 = vpop.permute.xlu0 %1384 }
 0x1ac   : > { %1758 = vst.msk [vmem:[%s3475_s23 + $0x68] sm:$0xff] %vm1744_vm1, %v1387_v34  ;;  %1757 = vst.msk [vmem:[%s3475_s23 + $0x60] sm:$0xff] %vm1744_vm1, %v1385_v63  ;;  %1514 = vrot.lane.b32.xlu1 %v1181_v38, %s2079_s20  ;;  %1512 = vrot.lane.b32.xlu0 %v1180_v60, %s2079_s20  ;;  %v1191_v60 = vmul.f32 %v3265_v48, %v4331_v50  ;;  %v4332_v34 = vld [vmem:[#allocation89_spill] sm:$0xff]  ;;  %v1192_v48 = vmul.f32 %v3277_v4, %v4334_v43  ;;  %v4345_v50 = vld [vmem:[#allocation102_spill] sm:$0xff] }
 0x1ad   : > { %v1190_v49 = vmul.f32 %v3267_v57, %v4332_v34  ;;  %v4346_v34 = vld [vmem:[#allocation103_spill] sm:$0xff]  ;;  %v4349_v43 = vld [vmem:[#allocation106_spill] sm:$0xff] }
 0x1af   : > { %v1391_v44 = vpop.permute.xlu1 %1390  ;;  %v1389_v9 = vpop.permute.xlu0 %1388 }
 0x1b0   : > { %1760 = vst.msk [vmem:[%s3475_s23 + $0x78] sm:$0xff] %vm1744_vm1, %v1391_v44  ;;  %1759 = vst.msk [vmem:[%s3475_s23 + $0x70] sm:$0xff] %vm1744_vm1, %v1389_v9  ;;  %1518 = vrot.lane.b32.xlu1 %v1183_v52, %s2079_s20  ;;  %1516 = vrot.lane.b32.xlu0 %v1182_v56, %s2079_s20  ;;  %v1193_v52 = vmul.f32 %v3275_v55, %v4333_v30  ;;  %v4335_v44 = vld [vmem:[#allocation92_spill] sm:$0xff]  ;;  %v1194_v55 = vmul.f32 %v3287_v13, %v4336_v40  ;;  %v4348_v30 = vld [vmem:[#allocation105_spill] sm:$0xff] }
 0x1b1   : > { %v1195_v9 = vmul.f32 %v3285_v51, %v4335_v44  ;;  %v4351_v44 = vld [vmem:[#allocation108_spill] sm:$0xff]  ;;  %v4352_v40 = vld [vmem:[#allocation109_spill] sm:$0xff] }
 0x1b3   : > { %v1395_v0 = vpop.permute.xlu1 %1394  ;;  %v1393_v11 = vpop.permute.xlu0 %1392 }
 0x1b4   : > { %1762 = vst.msk [vmem:[%s3475_s23 + $0x88] sm:$0xff] %vm1744_vm1, %v1395_v0  ;;  %1761 = vst.msk [vmem:[%s3475_s23 + $0x80] sm:$0xff] %vm1744_vm1, %v1393_v11  ;;  %1522 = vrot.lane.b32.xlu1 %v1185_v53, %s2079_s20  ;;  %1520 = vrot.lane.b32.xlu0 %v1184_v59, %s2079_s20  ;;  %v1197_v59 = vmul.f32 %v3295_v45, %v4337_v32  ;;  %v4338_v0 = vld [vmem:[#allocation95_spill] sm:$0xff]  ;;  %v1198_v45 = vmul.f32 %v3307_v17, %v4340_v28 }
 0x1b5   : > { %v1196_v51 = vmul.f32 %v3297_v15, %v4338_v0  ;;  %v4354_v32 = vld [vmem:[#allocation111_spill] sm:$0xff]  ;;  %v4355_v0 = vld [vmem:[#allocation112_spill] sm:$0xff] }
 0x1b6   : > { %v4358_v28 = vld [vmem:[#allocation115_spill] sm:$0xff] }
 0x1b7   : > { %v1399_v61 = vpop.permute.xlu1 %1398  ;;  %v1397_v10 = vpop.permute.xlu0 %1396 }
 0x1b8   : > { %1764 = vst.msk [vmem:[%s3475_s23 + $0x98] sm:$0xff] %vm1744_vm1, %v1399_v61  ;;  %1763 = vst.msk [vmem:[%s3475_s23 + $0x90] sm:$0xff] %vm1744_vm1, %v1397_v10  ;;  %1526 = vrot.lane.b32.xlu1 %v1187_v36, %s2079_s20  ;;  %1524 = vrot.lane.b32.xlu0 %v1186_v58, %s2079_s20  ;;  %v1199_v36 = vmul.f32 %v3305_v8, %v4339_v47  ;;  %v4341_v61 = vld [vmem:[#allocation98_spill] sm:$0xff]  ;;  %v1200_v8 = vmul.f32 %v3317_v19, %v4342_v41 }
 0x1b9   : > { %v1201_v10 = vmul.f32 %v3315_v6, %v4341_v61  ;;  %v4357_v47 = vld [vmem:[#allocation114_spill] sm:$0xff]  ;;  %v4360_v61 = vld [vmem:[#allocation117_spill] sm:$0xff] }
 0x1ba   : > { %v4361_v41 = vld [vmem:[#allocation118_spill] sm:$0xff] }
 0x1bb   : > { %v1403_v38 = vpop.permute.xlu1 %1402  ;;  %v1401_v1 = vpop.permute.xlu0 %1400 }
 0x1bc   : > { %1766 = vst.msk [vmem:[%s3475_s23 + $0xa8] sm:$0xff] %vm1744_vm1, %v1403_v38  ;;  %1765 = vst.msk [vmem:[%s3475_s23 + $0xa0] sm:$0xff] %vm1744_vm1, %v1401_v1  ;;  %1530 = vrot.lane.b32.xlu1 %v1189_v62, %s2079_s20  ;;  %1528 = vrot.lane.b32.xlu0 %v1188_v54, %s2079_s20  ;;  %v1203_v54 = vmul.f32 %v3325_v3, %v4343_v42  ;;  %v4344_v38 = vld [vmem:[#allocation101_spill] sm:$0xff]  ;;  %v1204_v3 = vmul.f32 %v3337_v23, %v4346_v34 }
 0x1bd   : > { %v1202_v6 = vmul.f32 %v3327_v21, %v4344_v38  ;;  %v4365_v38 = vld [vmem:[#allocation120_spill] sm:$0xff] }
 0x1bf   : > { %v1407_v63 = vpop.permute.xlu1 %1406  ;;  %v1405_v2 = vpop.permute.xlu0 %1404 }
 0x1c0   : > { %1768 = vst.msk [vmem:[%s3475_s23 + $0xb8] sm:$0xff] %vm1744_vm1, %v1407_v63  ;;  %1767 = vst.msk [vmem:[%s3475_s23 + $0xb0] sm:$0xff] %vm1744_vm1, %v1405_v2  ;;  %1534 = vrot.lane.b32.xlu1 %v1191_v60, %s2079_s20  ;;  %1532 = vrot.lane.b32.xlu0 %v1190_v49, %s2079_s20  ;;  %v1205_v60 = vmul.f32 %v3335_v7, %v4345_v50  ;;  %v4347_v63 = vld [vmem:[#allocation104_spill] sm:$0xff]  ;;  %v1206_v7 = vmul.f32 %v3347_v25, %v4348_v30  ;;  %v4368_v50 = vld [vmem:[#allocation6_spill] sm:$0xff] }
 0x1c1   : > { %v1207_v2 = vmul.f32 %v3345_v12, %v4347_v63  ;;  %v4372_v30 = vld [vmem:[#allocation8_spill] sm:$0xff] }
 0x1c3   : > { %v1411_v56 = vpop.permute.xlu1 %1410  ;;  %v1409_v57 = vpop.permute.xlu0 %1408 }
 0x1c4   : > { %1770 = vst.msk [vmem:[%s3475_s23 + $0xc8] sm:$0xff] %vm1744_vm1, %v1411_v56  ;;  %1769 = vst.msk [vmem:[%s3475_s23 + $0xc0] sm:$0xff] %vm1744_vm1, %v1409_v57  ;;  %1538 = vrot.lane.b32.xlu1 %v1193_v52, %s2079_s20  ;;  %1536 = vrot.lane.b32.xlu0 %v1192_v48, %s2079_s20  ;;  %v1209_v48 = vmul.f32 %v3355_v14, %v4349_v43  ;;  %v4350_v56 = vld [vmem:[#allocation107_spill] sm:$0xff]  ;;  %v1210_v14 = vmul.f32 %v3367_v29, %v4352_v40  ;;  %v4373_v43 = vld [vmem:[#allocation124_spill] sm:$0xff] }
 0x1c5   : > { %v1208_v12 = vmul.f32 %v3357_v27, %v4350_v56  ;;  %v4377_v40 = vld [vmem:[#allocation126_spill] sm:$0xff] }
 0x1c7   : > { %v1415_v53 = vpop.permute.xlu1 %1414  ;;  %v1413_v4 = vpop.permute.xlu0 %1412 }
 0x1c8   : > { %1772 = vst.msk [vmem:[%s3475_s23 + $0xd8] sm:$0xff] %vm1744_vm1, %v1415_v53  ;;  %1771 = vst.msk [vmem:[%s3475_s23 + $0xd0] sm:$0xff] %vm1744_vm1, %v1413_v4  ;;  %1542 = vrot.lane.b32.xlu1 %v1195_v9, %s2079_s20  ;;  %1540 = vrot.lane.b32.xlu0 %v1194_v55, %s2079_s20  ;;  %v1211_v9 = vmul.f32 %v3365_v5, %v4351_v44  ;;  %v4353_v53 = vld [vmem:[#allocation110_spill] sm:$0xff]  ;;  %v1212_v5 = vmul.f32 %v3377_v31, %v4354_v32  ;;  %v4379_v32 = vld [vmem:[#allocation128_spill] sm:$0xff] }
 0x1c9   : > { %v1213_v4 = vmul.f32 %v3375_v16, %v4353_v53 }
 0x1cb   : > { %v1419_v11 = vpop.permute.xlu1 %1418  ;;  %v1417_v13 = vpop.permute.xlu0 %1416 }
 0x1cc   : > { %1774 = vst.msk [vmem:[%s3475_s23 + $0xe8] sm:$0xff] %vm1744_vm1, %v1419_v11  ;;  %1773 = vst.msk [vmem:[%s3475_s23 + $0xe0] sm:$0xff] %vm1744_vm1, %v1417_v13  ;;  %1546 = vrot.lane.b32.xlu1 %v1197_v59, %s2079_s20  ;;  %1544 = vrot.lane.b32.xlu0 %v1196_v51, %s2079_s20  ;;  %v1215_v51 = vmul.f32 %v3385_v18, %v4355_v0  ;;  %v4356_v11 = vld [vmem:[#allocation113_spill] sm:$0xff]  ;;  %v1216_v18 = vmul.f32 %v3397_v35, %v4358_v28 }
 0x1cd   : > { %v1214_v16 = vmul.f32 %v3387_v33, %v4356_v11 }
 0x1cf   : > { %v1423_v58 = vpop.permute.xlu1 %1422  ;;  %v1421_v15 = vpop.permute.xlu0 %1420 }
 0x1d0   : > { %1776 = vst.msk [vmem:[%s3475_s23 + $0xf8] sm:$0xff] %vm1744_vm1, %v1423_v58  ;;  %1775 = vst.msk [vmem:[%s3475_s23 + $0xf0] sm:$0xff] %vm1744_vm1, %v1421_v15  ;;  %1550 = vrot.lane.b32.xlu1 %v1199_v36, %s2079_s20  ;;  %1548 = vrot.lane.b32.xlu0 %v1198_v45, %s2079_s20  ;;  %v1217_v36 = vmul.f32 %v3395_v20, %v4357_v47  ;;  %v4359_v58 = vld [vmem:[#allocation116_spill] sm:$0xff]  ;;  %v1218_v20 = vmul.f32 %v3407_v37, %v4360_v61 }
 0x1d1   : > { %v1219_v15 = vmul.f32 %v3405_v22, %v4359_v58  ;;  %v4364_v22 = vld [vmem:[#allocation4_spill] sm:$0xff] }
 0x1d3   : > { %v1427_v62 = vpop.permute.xlu1 %1426  ;;  %v1425_v17 = vpop.permute.xlu0 %1424 }
 0x1d4   : > { %1778 = vst.msk [vmem:[%s3475_s23 + $0x108] sm:$0xff] %vm1744_vm1, %v1427_v62  ;;  %1777 = vst.msk [vmem:[%s3475_s23 + $0x100] sm:$0xff] %vm1744_vm1, %v1425_v17  ;;  %1554 = vrot.lane.b32.xlu1 %v1201_v10, %s2079_s20  ;;  %1552 = vrot.lane.b32.xlu0 %v1200_v8, %s2079_s20  ;;  %v4362_v8 = vld [vmem:[#allocation130_spill] sm:$0xff]  ;;  %v4363_v17 = vld [vmem:[#allocation119_spill] sm:$0xff] }
 0x1d5   : > { %v1221_v62 = vmul.f32 %v4362_v8, %v4361_v41  ;;  %v1220_v42 = vmul.f32 %v4364_v22, %v4363_v17 }
 0x1d7   : > { %v1431_v1 = vpop.permute.xlu1 %1430  ;;  %v1429_v19 = vpop.permute.xlu0 %1428 }
 0x1d8   : > { %1780 = vst.msk [vmem:[%s3475_s23 + $0x118] sm:$0xff] %vm1744_vm1, %v1431_v1  ;;  %1779 = vst.msk [vmem:[%s3475_s23 + $0x110] sm:$0xff] %vm1744_vm1, %v1429_v19  ;;  %1558 = vrot.lane.b32.xlu1 %v1203_v54, %s2079_s20  ;;  %1556 = vrot.lane.b32.xlu0 %v1202_v6, %s2079_s20  ;;  %v4366_v6 = vld [vmem:[#allocation131_spill] sm:$0xff]  ;;  %v4367_v19 = vld [vmem:[#allocation121_spill] sm:$0xff] }
 0x1d9   : > { %v1223_v1 = vmul.f32 %v4366_v6, %v4365_v38 }
 0x1db   : > { %v1435_v49 = vpop.permute.xlu1 %1434  ;;  %v1433_v21 = vpop.permute.xlu0 %1432 }
 0x1dc   : > { %1782 = vst.msk [vmem:[%s3475_s23 + $0x128] sm:$0xff] %vm1744_vm1, %v1435_v49  ;;  %1781 = vst.msk [vmem:[%s3475_s23 + $0x120] sm:$0xff] %vm1744_vm1, %v1433_v21  ;;  %1562 = vrot.lane.b32.xlu1 %v1205_v60, %s2079_s20  ;;  %1560 = vrot.lane.b32.xlu0 %v1204_v3, %s2079_s20  ;;  %v1222_v60 = vmul.f32 %v4368_v50, %v4367_v19  ;;  %v4369_v49 = vld [vmem:[#allocation122_spill] sm:$0xff]  ;;  %v4370_v21 = vld [vmem:[#allocation7_spill] sm:$0xff] }
 0x1dd   : > { %v1225_v63 = vmul.f32 %v4370_v21, %v4369_v49 }
 0x1df   : > { %v1439_v52 = vpop.permute.xlu1 %1438  ;;  %v1437_v23 = vpop.permute.xlu0 %1436 }
 0x1e0   : > { %1784 = vst.msk [vmem:[%s3475_s23 + $0x138] sm:$0xff] %vm1744_vm1, %v1439_v52  ;;  %1783 = vst.msk [vmem:[%s3475_s23 + $0x130] sm:$0xff] %vm1744_vm1, %v1437_v23  ;;  %1566 = vrot.lane.b32.xlu1 %v1207_v2, %s2079_s20  ;;  %1564 = vrot.lane.b32.xlu0 %v1206_v7, %s2079_s20  ;;  %v4371_v2 = vld [vmem:[#allocation123_spill] sm:$0xff] }
 0x1e1   : > { %v1224_v7 = vmul.f32 %v4372_v30, %v4371_v2 }
 0x1e3   : > { %v1443_v57 = vpop.permute.xlu1 %1442  ;;  %v1441_v25 = vpop.permute.xlu0 %1440 }
 0x1e4   : > { %1786 = vst.msk [vmem:[%s3475_s23 + $0x148] sm:$0xff] %vm1744_vm1, %v1443_v57  ;;  %1785 = vst.msk [vmem:[%s3475_s23 + $0x140] sm:$0xff] %vm1744_vm1, %v1441_v25  ;;  %1570 = vrot.lane.b32.xlu1 %v1209_v48, %s2079_s20  ;;  %1568 = vrot.lane.b32.xlu0 %v1208_v12, %s2079_s20  ;;  %v4374_v48 = vld [vmem:[#allocation9_spill] sm:$0xff]  ;;  %v4376_v57 = vld [vmem:[#allocation132_spill] sm:$0xff] }
 0x1e5   : > { %v1227_v56 = vmul.f32 %v4374_v48, %v4373_v43  ;;  %v4375_v12 = vld [vmem:[#allocation125_spill] sm:$0xff] }
 0x1e6   : > { %v1226_v25 = vmul.f32 %v4376_v57, %v4375_v12 }
 0x1e7   : > { %v1447_v55 = vpop.permute.xlu1 %1446  ;;  %v1445_v27 = vpop.permute.xlu0 %1444 }
 0x1e8   : > { %1788 = vst.msk [vmem:[%s3475_s23 + $0x158] sm:$0xff] %vm1744_vm1, %v1447_v55  ;;  %1787 = vst.msk [vmem:[%s3475_s23 + $0x150] sm:$0xff] %vm1744_vm1, %v1445_v27  ;;  %1574 = vrot.lane.b32.xlu1 %v1211_v9, %s2079_s20  ;;  %1572 = vrot.lane.b32.xlu0 %v1210_v14, %s2079_s20  ;;  %v1229_v14 = vmul.f32 %v3455_v24, %v4377_v40  ;;  %v4378_v55 = vld [vmem:[#allocation127_spill] sm:$0xff]  ;;  %v1231_v24 = vmul.f32 %v3465_v26, %v4379_v32 }
 0x1e9   : > { %v1228_v27 = vmul.f32 %v3457_v46, %v4378_v55 }
 0x1eb   : > { %v1451_v59 = vpop.permute.xlu1 %1450  ;;  %v1449_v29 = vpop.permute.xlu0 %1448 }
 0x1ec   : > { %1790 = vst.msk [vmem:[%s3475_s23 + $0x168] sm:$0xff] %vm1744_vm1, %v1451_v59  ;;  %1789 = vst.msk [vmem:[%s3475_s23 + $0x160] sm:$0xff] %vm1744_vm1, %v1449_v29  ;;  %1578 = vrot.lane.b32.xlu1 %v1213_v4, %s2079_s20  ;;  %1576 = vrot.lane.b32.xlu0 %v1212_v5, %s2079_s20  ;;  %v4380_v5 = vld [vmem:[#allocation129_spill] sm:$0xff] }
 0x1ed   : > { %v1230_v46 = vmul.f32 %v3467_v39, %v4380_v5 }
 0x1ef   : > { %v1455_v13 = vpop.permute.xlu1 %1454  ;;  %v1453_v31 = vpop.permute.xlu0 %1452 }
 0x1f0   : > { %1792 = vst.msk [vmem:[%s3475_s23 + $0x178] sm:$0xff] %vm1744_vm1, %v1455_v13  ;;  %1791 = vst.msk [vmem:[%s3475_s23 + $0x170] sm:$0xff] %vm1744_vm1, %v1453_v31  ;;  %1582 = vrot.lane.b32.xlu1 %v1215_v51, %s2079_s20  ;;  %1580 = vrot.lane.b32.xlu0 %v1214_v16, %s2079_s20 }
 0x1f3   : > { %v1459_v45 = vpop.permute.xlu1 %1458  ;;  %v1457_v33 = vpop.permute.xlu0 %1456 }
 0x1f4   : > { %1794 = vst.msk [vmem:[%s3475_s23 + $0x188] sm:$0xff] %vm1744_vm1, %v1459_v45  ;;  %1793 = vst.msk [vmem:[%s3475_s23 + $0x180] sm:$0xff] %vm1744_vm1, %v1457_v33  ;;  %1586 = vrot.lane.b32.xlu1 %v1217_v36, %s2079_s20  ;;  %1584 = vrot.lane.b32.xlu0 %v1216_v18, %s2079_s20 }
 0x1f7   : > { %v1463_v10 = vpop.permute.xlu1 %1462  ;;  %v1461_v35 = vpop.permute.xlu0 %1460 }
 0x1f8   : > { %1796 = vst.msk [vmem:[%s3475_s23 + $0x198] sm:$0xff] %vm1744_vm1, %v1463_v10  ;;  %1795 = vst.msk [vmem:[%s3475_s23 + $0x190] sm:$0xff] %vm1744_vm1, %v1461_v35  ;;  %1590 = vrot.lane.b32.xlu1 %v1219_v15, %s2079_s20  ;;  %1588 = vrot.lane.b32.xlu0 %v1218_v20, %s2079_s20 }
 0x1fb   : > { %v1467_v54 = vpop.permute.xlu1 %1466  ;;  %v1465_v37 = vpop.permute.xlu0 %1464 }
 0x1fc   : > { %1798 = vst.msk [vmem:[%s3475_s23 + $0x1a8] sm:$0xff] %vm1744_vm1, %v1467_v54  ;;  %1797 = vst.msk [vmem:[%s3475_s23 + $0x1a0] sm:$0xff] %vm1744_vm1, %v1465_v37  ;;  %1594 = vrot.lane.b32.xlu1 %v1221_v62, %s2079_s20  ;;  %1592 = vrot.lane.b32.xlu0 %v1220_v42, %s2079_s20 }
 0x1ff   : > { %v1471_v34 = vpop.permute.xlu1 %1470  ;;  %v1469_v3 = vpop.permute.xlu0 %1468 }
 0x200   : > { %1800 = vst.msk [vmem:[%s3475_s23 + $0x1b8] sm:$0xff] %vm1744_vm1, %v1471_v34  ;;  %1799 = vst.msk [vmem:[%s3475_s23 + $0x1b0] sm:$0xff] %vm1744_vm1, %v1469_v3  ;;  %1598 = vrot.lane.b32.xlu1 %v1223_v1, %s2079_s20  ;;  %1596 = vrot.lane.b32.xlu0 %v1222_v60, %s2079_s20 }
 0x203   : > { %v1475_v52 = vpop.permute.xlu1 %1474  ;;  %v1473_v23 = vpop.permute.xlu0 %1472 }
 0x204   : > { %1802 = vst.msk [vmem:[%s3475_s23 + $0x1c8] sm:$0xff] %vm1744_vm1, %v1475_v52  ;;  %1801 = vst.msk [vmem:[%s3475_s23 + $0x1c0] sm:$0xff] %vm1744_vm1, %v1473_v23  ;;  %1602 = vrot.lane.b32.xlu1 %v1225_v63, %s2079_s20  ;;  %1600 = vrot.lane.b32.xlu0 %v1224_v7, %s2079_s20 }
 0x207   : > { %v1479_v44 = vpop.permute.xlu1 %1478  ;;  %v1477_v9 = vpop.permute.xlu0 %1476 }
 0x208   : > { %1804 = vst.msk [vmem:[%s3475_s23 + $0x1d8] sm:$0xff] %vm1744_vm1, %v1479_v44  ;;  %1803 = vst.msk [vmem:[%s3475_s23 + $0x1d0] sm:$0xff] %vm1744_vm1, %v1477_v9  ;;  %1606 = vrot.lane.b32.xlu1 %v1227_v56, %s2079_s20  ;;  %1604 = vrot.lane.b32.xlu0 %v1226_v25, %s2079_s20 }
 0x20b   : > { %v1483_v53 = vpop.permute.xlu1 %1482  ;;  %v1481_v4 = vpop.permute.xlu0 %1480 }
 0x20c   : > { %1806 = vst.msk [vmem:[%s3475_s23 + $0x1e8] sm:$0xff] %vm1744_vm1, %v1483_v53  ;;  %1805 = vst.msk [vmem:[%s3475_s23 + $0x1e0] sm:$0xff] %vm1744_vm1, %v1481_v4  ;;  %1610 = vrot.lane.b32.xlu1 %v1229_v14, %s2079_s20  ;;  %1608 = vrot.lane.b32.xlu0 %v1228_v27, %s2079_s20 }
 0x20f   : > { %v1487_v59 = vpop.permute.xlu1 %1486  ;;  %v1485_v29 = vpop.permute.xlu0 %1484 }
 0x210   : > { %1808 = vst.msk [vmem:[%s3475_s23 + $0x1f8] sm:$0xff] %vm1744_vm1, %v1487_v59  ;;  %1807 = vst.msk [vmem:[%s3475_s23 + $0x1f0] sm:$0xff] %vm1744_vm1, %v1485_v29  ;;  %1614 = vrot.lane.b32.xlu1 %v1231_v24, %s2079_s20  ;;  %1612 = vrot.lane.b32.xlu0 %v1230_v46, %s2079_s20 }
 0x213   : > { %v1491_v0 = vpop.permute.xlu1 %1490  ;;  %v1489_v51 = vpop.permute.xlu0 %1488 }
 0x214   : > { %1810 = vst.msk [vmem:[%s3475_s23 + $0x208] sm:$0xff] %vm1744_vm1, %v1491_v0  ;;  %1809 = vst.msk [vmem:[%s3475_s23 + $0x200] sm:$0xff] %vm1744_vm1, %v1489_v51 }
 0x217   : > { %v1495_v26 = vpop.permute.xlu1 %1494  ;;  %v1493_v39 = vpop.permute.xlu0 %1492 }
 0x218   : > { %1812 = vst.msk [vmem:[%s3475_s23 + $0x218] sm:$0xff] %vm1744_vm1, %v1495_v26  ;;  %1811 = vst.msk [vmem:[%s3475_s23 + $0x210] sm:$0xff] %vm1744_vm1, %v1493_v39 }
 0x21b   : > { %v1499_v11 = vpop.permute.xlu1 %1498  ;;  %v1497_v16 = vpop.permute.xlu0 %1496 }
 0x21c   : > { %1814 = vst.msk [vmem:[%s3475_s23 + $0x228] sm:$0xff] %vm1744_vm1, %v1499_v11  ;;  %1813 = vst.msk [vmem:[%s3475_s23 + $0x220] sm:$0xff] %vm1744_vm1, %v1497_v16 }
 0x21f   : > { %v1503_v13 = vpop.permute.xlu1 %1502  ;;  %v1501_v31 = vpop.permute.xlu0 %1500 }
 0x220   : > { %1816 = vst.msk [vmem:[%s3475_s23 + $0x238] sm:$0xff] %vm1744_vm1, %v1503_v13  ;;  %1815 = vst.msk [vmem:[%s3475_s23 + $0x230] sm:$0xff] %vm1744_vm1, %v1501_v31 }
 0x223   : > { %v1507_v47 = vpop.permute.xlu1 %1506  ;;  %v1505_v36 = vpop.permute.xlu0 %1504 }
 0x224   : > { %1818 = vst.msk [vmem:[%s3475_s23 + $0x248] sm:$0xff] %vm1744_vm1, %v1507_v47  ;;  %1817 = vst.msk [vmem:[%s3475_s23 + $0x240] sm:$0xff] %vm1744_vm1, %v1505_v36 }
 0x227   : > { %v1511_v28 = vpop.permute.xlu1 %1510  ;;  %v1509_v18 = vpop.permute.xlu0 %1508 }
 0x228   : > { %1820 = vst.msk [vmem:[%s3475_s23 + $0x258] sm:$0xff] %vm1744_vm1, %v1511_v28  ;;  %1819 = vst.msk [vmem:[%s3475_s23 + $0x250] sm:$0xff] %vm1744_vm1, %v1509_v18 }
 0x22b   : > { %v1515_v45 = vpop.permute.xlu1 %1514  ;;  %v1513_v33 = vpop.permute.xlu0 %1512 }
 0x22c   : > { %1822 = vst.msk [vmem:[%s3475_s23 + $0x268] sm:$0xff] %vm1744_vm1, %v1515_v45  ;;  %1821 = vst.msk [vmem:[%s3475_s23 + $0x260] sm:$0xff] %vm1744_vm1, %v1513_v33 }
 0x22f   : > { %v1519_v58 = vpop.permute.xlu1 %1518  ;;  %v1517_v15 = vpop.permute.xlu0 %1516 }
 0x230   : > { %1824 = vst.msk [vmem:[%s3475_s23 + $0x278] sm:$0xff] %vm1744_vm1, %v1519_v58  ;;  %1823 = vst.msk [vmem:[%s3475_s23 + $0x270] sm:$0xff] %vm1744_vm1, %v1517_v15 }
 0x233   : > { %v1523_v61 = vpop.permute.xlu1 %1522  ;;  %v1521_v20 = vpop.permute.xlu0 %1520 }
 0x234   : > { %1826 = vst.msk [vmem:[%s3475_s23 + $0x288] sm:$0xff] %vm1744_vm1, %v1523_v61  ;;  %1825 = vst.msk [vmem:[%s3475_s23 + $0x280] sm:$0xff] %vm1744_vm1, %v1521_v20 }
 0x237   : > { %v1527_v10 = vpop.permute.xlu1 %1526  ;;  %v1525_v35 = vpop.permute.xlu0 %1524 }
 0x238   : > { %1828 = vst.msk [vmem:[%s3475_s23 + $0x298] sm:$0xff] %vm1744_vm1, %v1527_v10  ;;  %1827 = vst.msk [vmem:[%s3475_s23 + $0x290] sm:$0xff] %vm1744_vm1, %v1525_v35 }
 0x23b   : > { %v1531_v41 = vpop.permute.xlu1 %1530  ;;  %v1529_v8 = vpop.permute.xlu0 %1528 }
 0x23c   : > { %1830 = vst.msk [vmem:[%s3475_s23 + $0x2a8] sm:$0xff] %vm1744_vm1, %v1531_v41  ;;  %1829 = vst.msk [vmem:[%s3475_s23 + $0x2a0] sm:$0xff] %vm1744_vm1, %v1529_v8 }
 0x23f   : > { %v1535_v62 = vpop.permute.xlu1 %1534  ;;  %v1533_v17 = vpop.permute.xlu0 %1532 }
 0x240   : > { %1832 = vst.msk [vmem:[%s3475_s23 + $0x2b8] sm:$0xff] %vm1744_vm1, %v1535_v62  ;;  %1831 = vst.msk [vmem:[%s3475_s23 + $0x2b0] sm:$0xff] %vm1744_vm1, %v1533_v17 }
 0x243   : > { %v1539_v22 = vpop.permute.xlu1 %1538  ;;  %v1537_v42 = vpop.permute.xlu0 %1536 }
 0x244   : > { %1834 = vst.msk [vmem:[%s3475_s23 + $0x2c8] sm:$0xff] %vm1744_vm1, %v1539_v22  ;;  %1833 = vst.msk [vmem:[%s3475_s23 + $0x2c0] sm:$0xff] %vm1744_vm1, %v1537_v42 }
 0x247   : > { %v1543_v54 = vpop.permute.xlu1 %1542  ;;  %v1541_v37 = vpop.permute.xlu0 %1540 }
 0x248   : > { %1836 = vst.msk [vmem:[%s3475_s23 + $0x2d8] sm:$0xff] %vm1744_vm1, %v1543_v54  ;;  %1835 = vst.msk [vmem:[%s3475_s23 + $0x2d0] sm:$0xff] %vm1744_vm1, %v1541_v37 }
 0x24b   : > { %v1547_v38 = vpop.permute.xlu1 %1546  ;;  %v1545_v6 = vpop.permute.xlu0 %1544 }
 0x24c   : > { %1838 = vst.msk [vmem:[%s3475_s23 + $0x2e8] sm:$0xff] %vm1744_vm1, %v1547_v38  ;;  %1837 = vst.msk [vmem:[%s3475_s23 + $0x2e0] sm:$0xff] %vm1744_vm1, %v1545_v6 }
 0x24f   : > { %v1551_v1 = vpop.permute.xlu1 %1550  ;;  %v1549_v19 = vpop.permute.xlu0 %1548 }
 0x250   : > { %1840 = vst.msk [vmem:[%s3475_s23 + $0x2f8] sm:$0xff] %vm1744_vm1, %v1551_v1  ;;  %1839 = vst.msk [vmem:[%s3475_s23 + $0x2f0] sm:$0xff] %vm1744_vm1, %v1549_v19 }
 0x253   : > { %v1555_v50 = vpop.permute.xlu1 %1554  ;;  %v1553_v60 = vpop.permute.xlu0 %1552 }
 0x254   : > { %1842 = vst.msk [vmem:[%s3475_s23 + $0x308] sm:$0xff] %vm1744_vm1, %v1555_v50  ;;  %1841 = vst.msk [vmem:[%s3475_s23 + $0x300] sm:$0xff] %vm1744_vm1, %v1553_v60 }
 0x257   : > { %v1559_v34 = vpop.permute.xlu1 %1558  ;;  %v1557_v3 = vpop.permute.xlu0 %1556 }
 0x258   : > { %1844 = vst.msk [vmem:[%s3475_s23 + $0x318] sm:$0xff] %vm1744_vm1, %v1559_v34  ;;  %1843 = vst.msk [vmem:[%s3475_s23 + $0x310] sm:$0xff] %vm1744_vm1, %v1557_v3 }
 0x25b   : > { %v1563_v49 = vpop.permute.xlu1 %1562  ;;  %v1561_v21 = vpop.permute.xlu0 %1560 }
 0x25c   : > { %1846 = vst.msk [vmem:[%s3475_s23 + $0x328] sm:$0xff] %vm1744_vm1, %v1563_v49  ;;  %1845 = vst.msk [vmem:[%s3475_s23 + $0x320] sm:$0xff] %vm1744_vm1, %v1561_v21 }
 0x25f   : > { %v1567_v63 = vpop.permute.xlu1 %1566  ;;  %v1565_v2 = vpop.permute.xlu0 %1564 }
 0x260   : > { %1848 = vst.msk [vmem:[%s3475_s23 + $0x338] sm:$0xff] %vm1744_vm1, %v1567_v63  ;;  %1847 = vst.msk [vmem:[%s3475_s23 + $0x330] sm:$0xff] %vm1744_vm1, %v1565_v2 }
 0x263   : > { %v1571_v30 = vpop.permute.xlu1 %1570  ;;  %v1569_v7 = vpop.permute.xlu0 %1568 }
 0x264   : > { %1850 = vst.msk [vmem:[%s3475_s23 + $0x348] sm:$0xff] %vm1744_vm1, %v1571_v30  ;;  %1849 = vst.msk [vmem:[%s3475_s23 + $0x340] sm:$0xff] %vm1744_vm1, %v1569_v7 }
 0x267   : > { %v1575_v52 = vpop.permute.xlu1 %1574  ;;  %v1573_v23 = vpop.permute.xlu0 %1572 }
 0x268   : > { %1852 = vst.msk [vmem:[%s3475_s23 + $0x358] sm:$0xff] %vm1744_vm1, %v1575_v52  ;;  %1851 = vst.msk [vmem:[%s3475_s23 + $0x350] sm:$0xff] %vm1744_vm1, %v1573_v23 }
 0x26b   : > { %v1579_v43 = vpop.permute.xlu1 %1578  ;;  %v1577_v48 = vpop.permute.xlu0 %1576 }
 0x26c   : > { %1854 = vst.msk [vmem:[%s3475_s23 + $0x368] sm:$0xff] %vm1744_vm1, %v1579_v43  ;;  %1853 = vst.msk [vmem:[%s3475_s23 + $0x360] sm:$0xff] %vm1744_vm1, %v1577_v48 }
 0x26f   : > { %v1583_v56 = vpop.permute.xlu1 %1582  ;;  %v1581_v12 = vpop.permute.xlu0 %1580 }
 0x270   : > { %1856 = vst.msk [vmem:[%s3475_s23 + $0x378] sm:$0xff] %vm1744_vm1, %v1583_v56  ;;  %1855 = vst.msk [vmem:[%s3475_s23 + $0x370] sm:$0xff] %vm1744_vm1, %v1581_v12 }
 0x273   : > { %v1587_v57 = vpop.permute.xlu1 %1586  ;;  %v1585_v25 = vpop.permute.xlu0 %1584 }
 0x274   : > { %1858 = vst.msk [vmem:[%s3475_s23 + $0x388] sm:$0xff] %vm1744_vm1, %v1587_v57  ;;  %1857 = vst.msk [vmem:[%s3475_s23 + $0x380] sm:$0xff] %vm1744_vm1, %v1585_v25 }
 0x277   : > { %v1591_v44 = vpop.permute.xlu1 %1590  ;;  %v1589_v9 = vpop.permute.xlu0 %1588 }
 0x278   : > { %1860 = vst.msk [vmem:[%s3475_s23 + $0x398] sm:$0xff] %vm1744_vm1, %v1591_v44  ;;  %1859 = vst.msk [vmem:[%s3475_s23 + $0x390] sm:$0xff] %vm1744_vm1, %v1589_v9 }
 0x27b   : > { %v1595_v40 = vpop.permute.xlu1 %1594  ;;  %v1593_v14 = vpop.permute.xlu0 %1592 }
 0x27c   : > { %1862 = vst.msk [vmem:[%s3475_s23 + $0x3a8] sm:$0xff] %vm1744_vm1, %v1595_v40  ;;  %1861 = vst.msk [vmem:[%s3475_s23 + $0x3a0] sm:$0xff] %vm1744_vm1, %v1593_v14 }
 0x27f   : > { %v1599_v55 = vpop.permute.xlu1 %1598  ;;  %v1597_v27 = vpop.permute.xlu0 %1596 }
 0x280   : > { %1864 = vst.msk [vmem:[%s3475_s23 + $0x3b8] sm:$0xff] %vm1744_vm1, %v1599_v55  ;;  %1863 = vst.msk [vmem:[%s3475_s23 + $0x3b0] sm:$0xff] %vm1744_vm1, %v1597_v27 }
 0x283   : > { %v1603_v53 = vpop.permute.xlu1 %1602  ;;  %v1601_v4 = vpop.permute.xlu0 %1600 }
 0x284   : > { %1866 = vst.msk [vmem:[%s3475_s23 + $0x3c8] sm:$0xff] %vm1744_vm1, %v1603_v53  ;;  %1865 = vst.msk [vmem:[%s3475_s23 + $0x3c0] sm:$0xff] %vm1744_vm1, %v1601_v4 }
 0x287   : > { %v1607_v32 = vpop.permute.xlu1 %1606  ;;  %v1605_v24 = vpop.permute.xlu0 %1604 }
 0x288   : > { %1868 = vst.msk [vmem:[%s3475_s23 + $0x3d8] sm:$0xff] %vm1744_vm1, %v1607_v32  ;;  %1867 = vst.msk [vmem:[%s3475_s23 + $0x3d0] sm:$0xff] %vm1744_vm1, %v1605_v24 }
 0x28b   : > { %v1611_v5 = vpop.permute.xlu1 %1610  ;;  %v1609_v46 = vpop.permute.xlu0 %1608 }
 0x28c   : > { %1870 = vst.msk [vmem:[%s3475_s23 + $0x3e8] sm:$0xff] %vm1744_vm1, %v1611_v5  ;;  %1869 = vst.msk [vmem:[%s3475_s23 + $0x3e0] sm:$0xff] %vm1744_vm1, %v1609_v46 }
 0x28f   : > { %v1615_v59 = vpop.permute.xlu1 %1614  ;;  %v1613_v29 = vpop.permute.xlu0 %1612 }
 0x290   : > { %1872 = vst.msk [vmem:[%s3475_s23 + $0x3f8] sm:$0xff] %vm1744_vm1, %v1615_v59  ;;  %1871 = vst.msk [vmem:[%s3475_s23 + $0x3f0] sm:$0xff] %vm1744_vm1, %v1613_v29 }
 0x291 PF: > { %s13_s11 = sadd.s32 1, %s2076_s11   ;;  %s4381_s9 = smov %s2072_s10 }
 0x292   : > { %p10_p5 = scmp.ge.s32.totalorder %s13_s11, 4   ;;  %s4382_s10 = smov %s4384_s12 }
 0x294   :  { %12 = sbr.rel (!%p10_p5) target bundleno = 2 (0x2), region = 66 }

</bundles_post_ra>
